<compile_context>
chip_gen: v6e
topology: v6e:2x2x1
jax: 0.10.0
libtpu: 0.0.40
codegen_flags: <defaults>
</compile_context>

<pallas_src>
import functools
import math

import jax
import jax.numpy as jnp
from jax.experimental import pallas as pl
from jax.experimental.pallas import tpu as pltpu


_MM_VMEM_LIMIT = 32 * 1024 * 1024   # fits v7x (64 MiB physical) with headroom


# ------------------------------ small helpers ------------------------------

def _round_up(x, m):
    return ((x + m - 1) // m) * m


def _pad_axis(x, axis, target):
    pad = target - x.shape[axis]
    if pad == 0:
        return x
    widths = [(0, 0)] * x.ndim
    widths[axis] = (0, pad)
    return jnp.pad(x, widths)


def _choose_tile(dim, candidates, mult):
    """Return (padded_dim, tile) with padded_dim % tile == 0."""
    d = _round_up(dim, mult)
    for c in candidates:
        if d >= c and d % c == 0:
            return d, c
    c = candidates[-1]
    if d <= c:
        return d, d
    return _round_up(d, c), c


def _choose_m_tile(M):
    """Row (sublane) tile: prefer large tiles, fall back for tiny M."""
    Mp = _round_up(M, 8)
    for t in (512, 256, 128):
        if Mp % t == 0:
            return Mp, t
    if Mp <= 256:
        return Mp, Mp
    Mp = _round_up(Mp, 256)
    return Mp, 256


# ----------------------------- Pallas kernels ------------------------------

def _matmul_bias_kernel(x_ref, w_ref, b_ref, o_ref, acc_ref, *, activation):
    @pl.when(pl.program_id(2) == 0)
    def _init():
        acc_ref[...] = jnp.zeros_like(acc_ref)

    acc_ref[...] += jnp.dot(x_ref[...], w_ref[...],
                            preferred_element_type=jnp.float32)

    @pl.when(pl.program_id(2) == pl.num_programs(2) - 1)
    def _finalize():
        y = acc_ref[...] + b_ref[...]
        if activation == "gelu":
            # TODO(synk): HF BERT uses exact erf-GELU; tanh approximation here.
            y = 0.5 * y * (1.0 + jnp.tanh(
                0.7978845608028654 * (y + 0.044715 * y * y * y)))
        elif activation == "tanh":
            y = jnp.tanh(y)
        o_ref[...] = y.astype(o_ref.dtype)


def matmul_bias(x, w, b, activation=None, out_dtype=jnp.bfloat16,
                keep_n_pad=False):
    """y = act(x @ w + b), tiled/pipelined, bf16 operands, f32 accumulation."""
    M, K = x.shape
    N = w.shape[1]

    Mp, tm = _choose_m_tile(M)
    Kp, tk = _choose_tile(K, (512, 256, 128), 128)
    Np, tn = _choose_tile(N, (512, 256, 128), 128)

    xp = _pad_axis(_pad_axis(x.astype(jnp.bfloat16), 0, Mp), 1, Kp)
    wp = _pad_axis(_pad_axis(w.astype(jnp.bfloat16), 0, Kp), 1, Np)
    bp = _pad_axis(b.astype(jnp.float32).reshape(1, N), 1, Np)

    kern = functools.partial(_matmul_bias_kernel, activation=activation)
    out = pl.pallas_call(
        kern,
        out_shape=jax.ShapeDtypeStruct((Mp, Np), out_dtype),
        grid=(Mp // tm, Np // tn, Kp // tk),
        in_specs=[pl.BlockSpec((tm, tk), lambda i, j, k: (i, k)),
                  pl.BlockSpec((tk, tn), lambda i, j, k: (k, j)),
                  pl.BlockSpec((1, tn), lambda i, j, k: (0, j))],
        out_specs=pl.BlockSpec((tm, tn), lambda i, j, k: (i, j)),
        scratch_shapes=[pltpu.VMEM((tm, tn), jnp.float32)],
        compiler_params=pltpu.CompilerParams(
            dimension_semantics=("parallel", "parallel", "arbitrary"),
            vmem_limit_bytes=_MM_VMEM_LIMIT),
    )(xp, wp, bp)

    out = out[:M]
    if not keep_n_pad:
        out = out[:, :N]
    return out


def _matmul_res_ln_kernel(x_ref, w_ref, b_ref, r_ref, g_ref, bb_ref,
                          o_ref, acc_ref, *, eps):
    @pl.when(pl.program_id(1) == 0)
    def _init():
        acc_ref[...] = jnp.zeros_like(acc_ref)

    acc_ref[...] += jnp.dot(x_ref[...], w_ref[...],
                            preferred_element_type=jnp.float32)

    @pl.when(pl.program_id(1) == pl.num_programs(1) - 1)
    def _finalize():
        y = acc_ref[...] + b_ref[...] + r_ref[...].astype(jnp.float32)
        mu = jnp.mean(y, axis=-1, keepdims=True)
        var = jnp.mean((y - mu) ** 2, axis=-1, keepdims=True)
        yn = (y - mu) * jax.lax.rsqrt(var + eps)
        o_ref[...] = (yn * g_ref[...] + bb_ref[...]).astype(o_ref.dtype)


def matmul_residual_layernorm(x, w, b, residual, g, beta, eps=1e-12,
                              out_dtype=jnp.bfloat16):
    """LayerNorm((x @ w + b) + residual) * g + beta, fused in one kernel.
    N (= hidden) is kept as a single full-width block so LN stats are exact."""
    M, K = x.shape
    N = w.shape[1]

    Mp, tm = _choose_m_tile(M)
    Kp, tk = _choose_tile(K, (512, 256, 128), 128)

    xp = _pad_axis(_pad_axis(x.astype(jnp.bfloat16), 0, Mp), 1, Kp)
    wp = _pad_axis(w.astype(jnp.bfloat16), 0, Kp)
    rp = _pad_axis(residual.astype(jnp.bfloat16), 0, Mp)
    bp = b.astype(jnp.float32).reshape(1, N)
    gp = g.astype(jnp.float32).reshape(1, N)
    betap = beta.astype(jnp.float32).reshape(1, N)

    kern = functools.partial(_matmul_res_ln_kernel, eps=eps)
    out = pl.pallas_call(
        kern,
        out_shape=jax.ShapeDtypeStruct((Mp, N), out_dtype),
        grid=(Mp // tm, Kp // tk),
        in_specs=[pl.BlockSpec((tm, tk), lambda i, k: (i, k)),
                  pl.BlockSpec((tk, N), lambda i, k: (k, 0)),
                  pl.BlockSpec((1, N), lambda i, k: (0, 0)),
                  pl.BlockSpec((tm, N), lambda i, k: (i, 0)),
                  pl.BlockSpec((1, N), lambda i, k: (0, 0)),
                  pl.BlockSpec((1, N), lambda i, k: (0, 0))],
        out_specs=pl.BlockSpec((tm, N), lambda i, k: (i, 0)),
        scratch_shapes=[pltpu.VMEM((tm, N), jnp.float32)],
        compiler_params=pltpu.CompilerParams(
            dimension_semantics=("parallel", "arbitrary"),
            vmem_limit_bytes=_MM_VMEM_LIMIT),
    )(xp, wp, bp, rp, gp, betap)
    return out[:M]


def _layernorm_kernel(x_ref, g_ref, b_ref, o_ref, *, eps):
    x = x_ref[...].astype(jnp.float32)
    mu = jnp.mean(x, axis=-1, keepdims=True)
    var = jnp.mean((x - mu) ** 2, axis=-1, keepdims=True)
    y = (x - mu) * jax.lax.rsqrt(var + eps)
    o_ref[...] = (y * g_ref[...] + b_ref[...]).astype(o_ref.dtype)


def layernorm(x, g, b, eps=1e-12, out_dtype=jnp.bfloat16):
    """Row-tiled LayerNorm (used for the embedding sum)."""
    M, H = x.shape
    Mp = _round_up(M, 8)
    tm = min(Mp, 512)
    Mp = _round_up(Mp, tm)
    xp = _pad_axis(x, 0, Mp)

    kern = functools.partial(_layernorm_kernel, eps=eps)
    out = pl.pallas_call(
        kern,
        out_shape=jax.ShapeDtypeStruct((Mp, H), out_dtype),
        grid=(Mp // tm,),
        in_specs=[pl.BlockSpec((tm, H), lambda i: (i, 0)),
                  pl.BlockSpec((1, H), lambda i: (0, 0)),
                  pl.BlockSpec((1, H), lambda i: (0, 0))],
        out_specs=pl.BlockSpec((tm, H), lambda i: (i, 0)),
        compiler_params=pltpu.CompilerParams(
            dimension_semantics=("parallel",)),
    )(xp, g.astype(jnp.float32).reshape(1, H),
      b.astype(jnp.float32).reshape(1, H))
    return out[:M]


def _attention_kernel(qkv_ref, m_ref, o_ref, *, n_heads, head_dim, hidden,
                      scale):
    # One batch row per grid step; all heads processed here so the output
    # writeback is a lane-dense (S, H) slab.
    madd = m_ref[0]                                   # (1, S) additive mask
    ctx_heads = []
    for h in range(n_heads):
        lo = h * head_dim
        q = qkv_ref[0, :, pl.ds(lo, head_dim)]                      # (S, Dh)
        k = qkv_ref[0, :, pl.ds(hidden + lo, head_dim)]             # (S, Dh)
        v = qkv_ref[0, :, pl.ds(2 * hidden + lo, head_dim)]         # (S, Dh)
        # Fold 1/sqrt(Dh) into q (S*Dh mults instead of S*S); exact for the
        # usual power-of-two head dims.
        q = q * jnp.asarray(scale, dtype=q.dtype)
        s = jax.lax.dot_general(q, k, (((1,), (1,)), ((), ())),
                                preferred_element_type=jnp.float32)
        s = s + madd                                                 # (S, S)
        mx = jnp.max(s, axis=-1, keepdims=True)
        p = jnp.exp(s - mx)
        p = p * pl.reciprocal(jnp.sum(p, axis=-1, keepdims=True), approx=True)
        ctx_heads.append(jnp.dot(p.astype(v.dtype), v,
                                 preferred_element_type=jnp.float32))
    o_ref[0] = jnp.concatenate(ctx_heads, axis=-1).astype(o_ref.dtype)


def multihead_attention(qkv, mask_add, n_heads, head_dim, hidden, scale):
    """qkv: (B, S, >=3*hidden) bf16 (trailing pad columns, if any, ignored)."""
    B, S, QKV = qkv.shape
    kern = functools.partial(_attention_kernel, n_heads=n_heads,
                             head_dim=head_dim, hidden=hidden, scale=scale)
    # TODO(synk): for S > ~512 switch to a flash-style online softmax with a
    # KV grid axis + m/l/acc VMEM scratch so the (S,S) score tile stays flat.
    return pl.pallas_call(
        kern,
        out_shape=jax.ShapeDtypeStruct((B, S, hidden), jnp.bfloat16),
        grid=(B,),
        in_specs=[pl.BlockSpec((1, S, QKV), lambda b: (b, 0, 0)),
                  pl.BlockSpec((1, 1, S), lambda b: (b, 0, 0))],
        out_specs=pl.BlockSpec((1, S, hidden), lambda b: (b, 0, 0)),
        compiler_params=pltpu.CompilerParams(
            dimension_semantics=("parallel",),
            vmem_limit_bytes=_MM_VMEM_LIMIT),
    )(qkv, mask_add)


def _pooler_classifier_kernel(x_ref, pw_ref, pb_ref, cw_ref, cb_ref, o_ref):
    pooled = jnp.tanh(
        jnp.dot(x_ref[...], pw_ref[...], preferred_element_type=jnp.float32)
        + pb_ref[...])
    # TODO(synk): Dropout(0.3) between pooler and classifier is identity in
    # eval mode; training-mode stochastic dropout omitted.
    logits = (jnp.dot(pooled.astype(cw_ref.dtype), cw_ref[...],
                      preferred_element_type=jnp.float32) + cb_ref[...])
    o_ref[...] = logits


def pooler_classifier(x_cls, pool_w, pool_b, cls_w, cls_b):
    B, H = x_cls.shape
    C = cls_w.shape[1]
    Bp = _round_up(B, 8)       # avoid sub-8-sublane blocks
    Cp = _round_up(C, 128)     # lane-dense output (no masked partial stores)

    xp = _pad_axis(x_cls.astype(jnp.bfloat16), 0, Bp)
    cwp = _pad_axis(cls_w.astype(jnp.bfloat16), 1, Cp)
    cbp = _pad_axis(cls_b.astype(jnp.float32).reshape(1, C), 1, Cp)

    out = pl.pallas_call(
        _pooler_classifier_kernel,
        out_shape=jax.ShapeDtypeStruct((Bp, Cp), jnp.float32),
        in_specs=[pl.BlockSpec((Bp, H), lambda: (0, 0)),
                  pl.BlockSpec((H, H), lambda: (0, 0)),
                  pl.BlockSpec((1, H), lambda: (0, 0)),
                  pl.BlockSpec((H, Cp), lambda: (0, 0)),
                  pl.BlockSpec((1, Cp), lambda: (0, 0))],
        out_specs=pl.BlockSpec((Bp, Cp), lambda: (0, 0)),
    )(xp, pool_w.astype(jnp.bfloat16),
      pool_b.astype(jnp.float32).reshape(1, H), cwp, cbp)
    return out[:B, :C]


# --------------------------- parameter initialization ----------------------

def init_params(key, cfg):
    H, I, V, P, T, L, C = (cfg["hidden"], cfg["intermediate"], cfg["vocab"],
                           cfg["max_pos"], cfg["type_vocab"], cfg["layers"],
                           cfg["labels"])
    keys = iter(jax.random.split(key, 8 + 8 * L))
    bf16 = jnp.bfloat16

    def nrm(shape, dtype=jnp.float32):
        return (0.02 * jax.random.normal(next(keys), shape,
                                         jnp.float32)).astype(dtype)

    params = {
        "word_emb": nrm((V, H)),
        "pos_emb": nrm((P, H)),
        "type_emb": nrm((T, H)),
        "emb_ln_g": jnp.ones((H,), jnp.float32),
        "emb_ln_b": jnp.zeros((H,), jnp.float32),
        "pool_w": nrm((H, H), bf16),
        "pool_b": jnp.zeros((H,), jnp.float32),
        "cls_w": nrm((H, C), bf16),
        "cls_b": jnp.zeros((C,), jnp.float32),
        "layers": [],
    }
    for _ in range(L):
        params["layers"].append({
            # fused Q/K/V projection: one [H, 3H] matmul per layer
            "wqkv": nrm((H, 3 * H), bf16),
            "bqkv": jnp.zeros((3 * H,), jnp.float32),
            "wo": nrm((H, H), bf16), "bo": jnp.zeros((H,), jnp.float32),
            "ln1_g": jnp.ones((H,), jnp.float32),
            "ln1_b": jnp.zeros((H,), jnp.float32),
            "w1": nrm((H, I), bf16), "b1": jnp.zeros((I,), jnp.float32),
            "w2": nrm((I, H), bf16), "b2": jnp.zeros((H,), jnp.float32),
            "ln2_g": jnp.ones((H,), jnp.float32),
            "ln2_b": jnp.zeros((H,), jnp.float32),
        })
    return params


# ------------------------------- forward pass -------------------------------

def bert_class_forward(params, ids, mask, token_type_ids, cfg):
    B, S = ids.shape
    H, nH = cfg["hidden"], cfg["heads"]
    Dh = H // nH
    scale = 1.0 / math.sqrt(Dh)

    # Embedding gathers (glue) + row-tiled LayerNorm kernel; activations bf16.
    emb = (jnp.take(params["word_emb"], ids, axis=0)
           + jnp.take(params["pos_emb"], jnp.arange(S), axis=0)[None, :, :]
           + jnp.take(params["type_emb"], token_type_ids, axis=0))
    x = layernorm(emb.reshape(B * S, H), params["emb_ln_g"], params["emb_ln_b"])

    # HF BERT extended attention mask: (1 - mask) * -10000, shape (B, 1, S).
    mask_add = (1.0 - mask.astype(jnp.float32))[:, None, :] * -10000.0

    for lp in params["layers"]:
        # Fused QKV projection (lane-dense 3H-wide output; any pad columns
        # are simply ignored inside the attention kernel).
        qkv = matmul_bias(x, lp["wqkv"], lp["bqkv"], keep_n_pad=True)
        qkv = qkv.reshape(B, S, -1)
        ctx = multihead_attention(qkv, mask_add, nH, Dh, H, scale)
        # W_o projection fused with residual add + LayerNorm.
        x = matmul_residual_layernorm(ctx.reshape(B * S, H), lp["wo"], lp["bo"],
                                      residual=x, g=lp["ln1_g"],
                                      beta=lp["ln1_b"])
        # FFN: W1 + GELU, then W2 fused with residual add + LayerNorm.
        h1 = matmul_bias(x, lp["w1"], lp["b1"], activation="gelu")
        x = matmul_residual_layernorm(h1, lp["w2"], lp["b2"],
                                      residual=x, g=lp["ln2_g"],
                                      beta=lp["ln2_b"])

    # Pooler (dense + tanh on [CLS]) + Dropout(0.3, eval=identity) + classifier
    # fused into one padded small kernel.
    x_cls = x.reshape(B, S, H)[:, 0, :]
    logits = pooler_classifier(x_cls, params["pool_w"], params["pool_b"],
                               params["cls_w"], params["cls_b"])
    return logits  # (B, labels), f32


# ---------------------------------- main ------------------------------------

if __name__ == "__main__":
    cfg = dict(hidden=64, heads=4, intermediate=128, layers=2,
               vocab=128, max_pos=32, type_vocab=2, labels=6)
    B, S = 2, 8

    key = jax.random.PRNGKey(0)
    kp, kid = jax.random.split(key)
    params = init_params(kp, cfg)

    ids = jax.random.randint(kid, (B, S), 0, cfg["vocab"], dtype=jnp.int32)
    mask = jnp.array([[1, 1, 1, 1, 1, 1, 1, 1],
                      [1, 1, 1, 1, 1, 0, 0, 0]], dtype=jnp.int32)
    token_type_ids = jnp.array([[0, 0, 0, 0, 1, 1, 1, 1],
                                [0, 0, 0, 1, 1, 1, 1, 1]], dtype=jnp.int32)

    fwd = jax.jit(functools.partial(bert_class_forward, cfg=cfg))
    logits = fwd(params, ids, mask, token_type_ids)
    jax.block_until_ready(logits)

    assert logits.shape == (B, cfg["labels"])
    assert bool(jnp.all(jnp.isfinite(logits)))
    print("KERNEL_OK")
</pallas_src>

<mosaic_0001>
module attributes {stable_mosaic.version = 11 : i64} {
  func.func @_layernorm_kernel(%arg0: i32, %arg1: memref<16x64xf32, #tpu.memory_space<vmem>>, %arg2: memref<1x64xf32, #tpu.memory_space<vmem>>, %arg3: memref<1x64xf32, #tpu.memory_space<vmem>>, %arg4: memref<16x64xbf16, #tpu.memory_space<vmem>>) attributes {dimension_semantics = [#tpu.dimension_semantics<parallel>], iteration_bounds = array<i64: 1>, scalar_prefetch = 0 : i64, scratch_operands = 0 : i64, tpu.core_type = #tpu.core_type<tc>, window_params = [{transform_indices = @transform_0, window_bounds = array<i64: 16, 64>}, {pipeline_mode = #tpu.pipeline_mode<synchronous>, transform_indices = @transform_1, window_bounds = array<i64: 1, 64>}, {pipeline_mode = #tpu.pipeline_mode<synchronous>, transform_indices = @transform_2, window_bounds = array<i64: 1, 64>}, {transform_indices = @transform_3, window_bounds = array<i64: 16, 64>}]} {
    %c0 = arith.constant 0 : index
    %c0_0 = arith.constant 0 : index
    %0 = vector.load %arg1[%c0, %c0_0] : memref<16x64xf32, #tpu.memory_space<vmem>>, vector<16x64xf32>
    %cst = arith.constant dense<0.000000e+00> : vector<16xf32>
    %1 = vector.multi_reduction <add>, %0, %cst [1] : vector<16x64xf32> to vector<16xf32>
    %2 = vector.shape_cast %1 : vector<16xf32> to vector<16x1xf32>
    %cst_1 = arith.constant 6.400000e+01 : f32
    %3 = vector.broadcast %cst_1 : f32 to vector<16x1xf32>
    %4 = arith.divf %2, %3 : vector<16x1xf32>
    %5 = vector.broadcast %4 : vector<16x1xf32> to vector<16x64xf32>
    %6 = arith.subf %0, %5 : vector<16x64xf32>
    %7 = arith.mulf %6, %6 : vector<16x64xf32>
    %cst_2 = arith.constant dense<0.000000e+00> : vector<16xf32>
    %8 = vector.multi_reduction <add>, %7, %cst_2 [1] : vector<16x64xf32> to vector<16xf32>
    %9 = vector.shape_cast %8 : vector<16xf32> to vector<16x1xf32>
    %cst_3 = arith.constant 6.400000e+01 : f32
    %10 = vector.broadcast %cst_3 : f32 to vector<16x1xf32>
    %11 = arith.divf %9, %10 : vector<16x1xf32>
    %12 = vector.broadcast %4 : vector<16x1xf32> to vector<16x64xf32>
    %13 = arith.subf %0, %12 : vector<16x64xf32>
    %cst_4 = arith.constant 9.99999996E-13 : f32
    %14 = vector.broadcast %cst_4 : f32 to vector<16x1xf32>
    %15 = arith.addf %11, %14 : vector<16x1xf32>
    %16 = math.rsqrt %15 : vector<16x1xf32>
    %17 = vector.broadcast %16 : vector<16x1xf32> to vector<16x64xf32>
    %18 = arith.mulf %13, %17 : vector<16x64xf32>
    %c0_5 = arith.constant 0 : index
    %c0_6 = arith.constant 0 : index
    %19 = vector.load %arg2[%c0_5, %c0_6] : memref<1x64xf32, #tpu.memory_space<vmem>>, vector<1x64xf32>
    %20 = vector.broadcast %19 : vector<1x64xf32> to vector<16x64xf32>
    %21 = arith.mulf %18, %20 : vector<16x64xf32>
    %c0_7 = arith.constant 0 : index
    %c0_8 = arith.constant 0 : index
    %22 = vector.load %arg3[%c0_7, %c0_8] : memref<1x64xf32, #tpu.memory_space<vmem>>, vector<1x64xf32>
    %23 = vector.broadcast %22 : vector<1x64xf32> to vector<16x64xf32>
    %24 = arith.addf %21, %23 : vector<16x64xf32>
    %25 = arith.truncf %24 : vector<16x64xf32> to vector<16x64xbf16>
    %c0_9 = arith.constant 0 : index
    %c0_10 = arith.constant 0 : index
    %26 = vector.load %arg4[%c0_9, %c0_10] : memref<16x64xbf16, #tpu.memory_space<vmem>>, vector<16x64xbf16>
    tpu.vector_store %arg4[%c0_9, %c0_10], %25 {strides = array<i32>} : memref<16x64xbf16, #tpu.memory_space<vmem>>, vector<16x64xbf16>,
    return
  }
  func.func @transform_0(%arg0: i32) -> (i32, i32) {
    %c0_i32 = arith.constant 0 : i32
    %c0_i32_0 = arith.constant 0 : i32
    return %arg0, %c0_i32 : i32, i32
  }
  func.func @transform_1(%arg0: i32) -> (i32, i32) {
    %c0_i32 = arith.constant 0 : i32
    %c0_i32_0 = arith.constant 0 : i32
    %c0_i32_1 = arith.constant 0 : i32
    return %c0_i32, %c0_i32_0 : i32, i32
  }
  func.func @transform_2(%arg0: i32) -> (i32, i32) {
    %c0_i32 = arith.constant 0 : i32
    %c0_i32_0 = arith.constant 0 : i32
    %c0_i32_1 = arith.constant 0 : i32
    return %c0_i32, %c0_i32_0 : i32, i32
  }
  func.func @transform_3(%arg0: i32) -> (i32, i32) {
    %c0_i32 = arith.constant 0 : i32
    %c0_i32_0 = arith.constant 0 : i32
    return %arg0, %c0_i32 : i32, i32
  }
}

module attributes {stable_mosaic.version = 11 : i64} {
  func.func @_matmul_bias_kernel(%arg0: i32, %arg1: i32, %arg2: i32, %arg3: memref<16x128xbf16, #tpu.memory_space<vmem>>, %arg4: memref<128x256xbf16, #tpu.memory_space<vmem>>, %arg5: memref<1x256xf32, #tpu.memory_space<vmem>>, %arg6: memref<16x256xbf16, #tpu.memory_space<vmem>>, %arg7: memref<16x256xf32, #tpu.memory_space<vmem>>) attributes {dimension_semantics = [#tpu.dimension_semantics<parallel>, #tpu.dimension_semantics<parallel>, #tpu.dimension_semantics<arbitrary>], iteration_bounds = array<i64: 1, 1, 1>, scalar_prefetch = 0 : i64, scratch_operands = 1 : i64, tpu.core_type = #tpu.core_type<tc>, window_params = [{transform_indices = @transform_0, window_bounds = array<i64: 16, 128>}, {transform_indices = @transform_1, window_bounds = array<i64: 128, 256>}, {transform_indices = @transform_2, window_bounds = array<i64: 1, 256>}, {transform_indices = @transform_3, window_bounds = array<i64: 16, 256>}]} {
    %c0_i32 = arith.constant 0 : i32
    %0 = arith.cmpi eq, %arg2, %c0_i32 : i32
    %1 = arith.extui %0 : i1 to i32
    %c0_i32_0 = arith.constant 0 : i32
    %2 = arith.cmpi ne, %1, %c0_i32_0 : i32
    scf.if %2 {
      %cst_10 = arith.constant 0.000000e+00 : f32
      %12 = vector.broadcast %cst_10 : f32 to vector<16x256xf32>
      %c0_11 = arith.constant 0 : index
      %c0_12 = arith.constant 0 : index
      %13 = vector.load %arg7[%c0_11, %c0_12] : memref<16x256xf32, #tpu.memory_space<vmem>>, vector<16x256xf32>
      tpu.vector_store %arg7[%c0_11, %c0_12], %12 {strides = array<i32>} : memref<16x256xf32, #tpu.memory_space<vmem>>, vector<16x256xf32>,
    } else {
    }
    %c0 = arith.constant 0 : index
    %c0_1 = arith.constant 0 : index
    %3 = vector.load %arg7[%c0, %c0_1] : memref<16x256xf32, #tpu.memory_space<vmem>>, vector<16x256xf32>
    %c0_2 = arith.constant 0 : index
    %c0_3 = arith.constant 0 : index
    %4 = vector.load %arg3[%c0_2, %c0_3] : memref<16x128xbf16, #tpu.memory_space<vmem>>, vector<16x128xbf16>
    %c0_4 = arith.constant 0 : index
    %c0_5 = arith.constant 0 : index
    %5 = vector.load %arg4[%c0_4, %c0_5] : memref<128x256xbf16, #tpu.memory_space<vmem>>, vector<128x256xbf16>
    %cst = arith.constant dense<0.000000e+00> : vector<16x256xf32>
    %6 = tpu.matmul %4, %5, %cst {dimension_numbers = #tpu.dot_dimension_numbers<[1], [0], [0], [1], [0, 0, 1, 1], [], []>} : vector<16x128xbf16>, vector<128x256xbf16>, vector<16x256xf32> -> vector<16x256xf32>
    %7 = arith.addf %3, %6 : vector<16x256xf32>
    %c0_6 = arith.constant 0 : index
    %c0_7 = arith.constant 0 : index
    %8 = vector.load %arg7[%c0_6, %c0_7] : memref<16x256xf32, #tpu.memory_space<vmem>>, vector<16x256xf32>
    tpu.vector_store %arg7[%c0_6, %c0_7], %7 {strides = array<i32>} : memref<16x256xf32, #tpu.memory_space<vmem>>, vector<16x256xf32>,
    %c0_i32_8 = arith.constant 0 : i32
    %9 = arith.cmpi eq, %arg2, %c0_i32_8 : i32
    %10 = arith.extui %9 : i1 to i32
    %c0_i32_9 = arith.constant 0 : i32
    %11 = arith.cmpi ne, %10, %c0_i32_9 : i32
    scf.if %11 {
      %c0_10 = arith.constant 0 : index
      %c0_11 = arith.constant 0 : index
      %12 = vector.load %arg7[%c0_10, %c0_11] : memref<16x256xf32, #tpu.memory_space<vmem>>, vector<16x256xf32>
      %c0_12 = arith.constant 0 : index
      %c0_13 = arith.constant 0 : index
      %13 = vector.load %arg5[%c0_12, %c0_13] : memref<1x256xf32, #tpu.memory_space<vmem>>, vector<1x256xf32>
      %14 = vector.broadcast %13 : vector<1x256xf32> to vector<16x256xf32>
      %15 = arith.addf %12, %14 : vector<16x256xf32>
      %16 = arith.truncf %15 : vector<16x256xf32> to vector<16x256xbf16>
      %c0_14 = arith.constant 0 : index
      %c0_15 = arith.constant 0 : index
      %17 = vector.load %arg6[%c0_14, %c0_15] : memref<16x256xbf16, #tpu.memory_space<vmem>>, vector<16x256xbf16>
      tpu.vector_store %arg6[%c0_14, %c0_15], %16 {strides = array<i32>} : memref<16x256xbf16, #tpu.memory_space<vmem>>, vector<16x256xbf16>,
    } else {
    }
    return
  }
  func.func @transform_0(%arg0: i32, %arg1: i32, %arg2: i32) -> (i32, i32) {
    %c0_i32 = arith.constant 0 : i32
    return %arg0, %arg2 : i32, i32
  }
  func.func @transform_1(%arg0: i32, %arg1: i32, %arg2: i32) -> (i32, i32) {
    %c0_i32 = arith.constant 0 : i32
    return %arg2, %arg1 : i32, i32
  }
  func.func @transform_2(%arg0: i32, %arg1: i32, %arg2: i32) -> (i32, i32) {
    %c0_i32 = arith.constant 0 : i32
    %c0_i32_0 = arith.constant 0 : i32
    return %c0_i32, %arg1 : i32, i32
  }
  func.func @transform_3(%arg0: i32, %arg1: i32, %arg2: i32) -> (i32, i32) {
    %c0_i32 = arith.constant 0 : i32
    return %arg0, %arg1 : i32, i32
  }
}

module attributes {stable_mosaic.version = 11 : i64} {
  func.func @_attention_kernel(%arg0: i32, %arg1: memref<1x8x256xbf16, #tpu.memory_space<vmem>>, %arg2: memref<1x1x8xf32, #tpu.memory_space<vmem>>, %arg3: memref<1x8x64xbf16, #tpu.memory_space<vmem>>) attributes {dimension_semantics = [#tpu.dimension_semantics<parallel>], iteration_bounds = array<i64: 2>, scalar_prefetch = 0 : i64, scratch_operands = 0 : i64, tpu.core_type = #tpu.core_type<tc>, window_params = [{transform_indices = @transform_0, window_bounds = array<i64: 1, 8, 256>}, {transform_indices = @transform_1, window_bounds = array<i64: 1, 1, 8>}, {transform_indices = @transform_2, window_bounds = array<i64: 1, 8, 64>}]} {
    %c0 = arith.constant 0 : index
    %c0_0 = arith.constant 0 : index
    %c0_1 = arith.constant 0 : index
    %0 = vector.load %arg2[%c0, %c0_0, %c0_1] : memref<1x1x8xf32, #tpu.memory_space<vmem>>, vector<1x1x8xf32>
    %1 = vector.shape_cast %0 : vector<1x1x8xf32> to vector<1x8xf32>
    %c0_2 = arith.constant 0 : index
    %c0_3 = arith.constant 0 : index
    %c0_4 = arith.constant 0 : index
    %2 = vector.load %arg1[%c0_2, %c0_3, %c0_4] : memref<1x8x256xbf16, #tpu.memory_space<vmem>>, vector<1x8x16xbf16>
    %3 = vector.shape_cast %2 : vector<1x8x16xbf16> to vector<8x16xbf16>
    %c0_5 = arith.constant 0 : index
    %c0_6 = arith.constant 0 : index
    %c64 = arith.constant 64 : index
    %4 = vector.load %arg1[%c0_5, %c0_6, %c64] : memref<1x8x256xbf16, #tpu.memory_space<vmem>>, vector<1x8x16xbf16>
    %5 = vector.shape_cast %4 : vector<1x8x16xbf16> to vector<8x16xbf16>
    %c0_7 = arith.constant 0 : index
    %c0_8 = arith.constant 0 : index
    %c128 = arith.constant 128 : index
    %6 = vector.load %arg1[%c0_7, %c0_8, %c128] : memref<1x8x256xbf16, #tpu.memory_space<vmem>>, vector<1x8x16xbf16>
    %7 = vector.shape_cast %6 : vector<1x8x16xbf16> to vector<8x16xbf16>
    %cst = arith.constant 2.500000e-01 : bf16
    %8 = vector.broadcast %cst : bf16 to vector<8x16xbf16>
    %9 = arith.mulf %3, %8 : vector<8x16xbf16>
    %cst_9 = arith.constant dense<0.000000e+00> : vector<8x8xf32>
    %10 = tpu.matmul %9, %5, %cst_9 {dimension_numbers = #tpu.dot_dimension_numbers<[1], [1], [0], [0], [0, 0, 1, 0], [], []>} : vector<8x16xbf16>, vector<8x16xbf16>, vector<8x8xf32> -> vector<8x8xf32>
    %11 = vector.broadcast %1 : vector<1x8xf32> to vector<8x8xf32>
    %12 = arith.addf %10, %11 : vector<8x8xf32>
    %cst_10 = arith.constant dense<0xFF800000> : vector<8xf32>
    %13 = vector.multi_reduction <maximumf>, %12, %cst_10 [1] : vector<8x8xf32> to vector<8xf32>
    %14 = vector.shape_cast %13 : vector<8xf32> to vector<8x1xf32>
    %15 = vector.broadcast %14 : vector<8x1xf32> to vector<8x8xf32>
    %16 = arith.subf %12, %15 : vector<8x8xf32>
    %17 = math.exp %16 : vector<8x8xf32>
    %cst_11 = arith.constant dense<0.000000e+00> : vector<8xf32>
    %18 = vector.multi_reduction <add>, %17, %cst_11 [1] : vector<8x8xf32> to vector<8xf32>
    %19 = vector.shape_cast %18 : vector<8xf32> to vector<8x1xf32>
    %20 = tpu.reciprocal %19 {approx = true} : vector<8x1xf32> -> vector<8x1xf32>
    %21 = vector.broadcast %20 : vector<8x1xf32> to vector<8x8xf32>
    %22 = arith.mulf %17, %21 : vector<8x8xf32>
    %23 = arith.truncf %22 : vector<8x8xf32> to vector<8x8xbf16>
    %cst_12 = arith.constant dense<0.000000e+00> : vector<8x16xf32>
    %24 = tpu.matmul %23, %7, %cst_12 {dimension_numbers = #tpu.dot_dimension_numbers<[1], [0], [0], [1], [0, 0, 1, 1], [], []>} : vector<8x8xbf16>, vector<8x16xbf16>, vector<8x16xf32> -> vector<8x16xf32>
    %c0_13 = arith.constant 0 : index
    %c0_14 = arith.constant 0 : index
    %c16 = arith.constant 16 : index
    %25 = vector.load %arg1[%c0_13, %c0_14, %c16] : memref<1x8x256xbf16, #tpu.memory_space<vmem>>, vector<1x8x16xbf16>
    %26 = vector.shape_cast %25 : vector<1x8x16xbf16> to vector<8x16xbf16>
    %c0_15 = arith.constant 0 : index
    %c0_16 = arith.constant 0 : index
    %c80 = arith.constant 80 : index
    %27 = vector.load %arg1[%c0_15, %c0_16, %c80] : memref<1x8x256xbf16, #tpu.memory_space<vmem>>, vector<1x8x16xbf16>
    %28 = vector.shape_cast %27 : vector<1x8x16xbf16> to vector<8x16xbf16>
    %c0_17 = arith.constant 0 : index
    %c0_18 = arith.constant 0 : index
    %c144 = arith.constant 144 : index
    %29 = vector.load %arg1[%c0_17, %c0_18, %c144] : memref<1x8x256xbf16, #tpu.memory_space<vmem>>, vector<1x8x16xbf16>
    %30 = vector.shape_cast %29 : vector<1x8x16xbf16> to vector<8x16xbf16>
    %cst_19 = arith.constant 2.500000e-01 : bf16
    %31 = vector.broadcast %cst_19 : bf16 to vector<8x16xbf16>
    %32 = arith.mulf %26, %31 : vector<8x16xbf16>
    %cst_20 = arith.constant dense<0.000000e+00> : vector<8x8xf32>
    %33 = tpu.matmul %32, %28, %cst_20 {dimension_numbers = #tpu.dot_dimension_numbers<[1], [1], [0], [0], [0, 0, 1, 0], [], []>} : vector<8x16xbf16>, vector<8x16xbf16>, vector<8x8xf32> -> vector<8x8xf32>
    %34 = vector.broadcast %1 : vector<1x8xf32> to vector<8x8xf32>
    %35 = arith.addf %33, %34 : vector<8x8xf32>
    %cst_21 = arith.constant dense<0xFF800000> : vector<8xf32>
    %36 = vector.multi_reduction <maximumf>, %35, %cst_21 [1] : vector<8x8xf32> to vector<8xf32>
    %37 = vector.shape_cast %36 : vector<8xf32> to vector<8x1xf32>
    %38 = vector.broadcast %37 : vector<8x1xf32> to vector<8x8xf32>
    %39 = arith.subf %35, %38 : vector<8x8xf32>
    %40 = math.exp %39 : vector<8x8xf32>
    %cst_22 = arith.constant dense<0.000000e+00> : vector<8xf32>
    %41 = vector.multi_reduction <add>, %40, %cst_22 [1] : vector<8x8xf32> to vector<8xf32>
    %42 = vector.shape_cast %41 : vector<8xf32> to vector<8x1xf32>
    %43 = tpu.reciprocal %42 {approx = true} : vector<8x1xf32> -> vector<8x1xf32>
    %44 = vector.broadcast %43 : vector<8x1xf32> to vector<8x8xf32>
    %45 = arith.mulf %40, %44 : vector<8x8xf32>
    %46 = arith.truncf %45 : vector<8x8xf32> to vector<8x8xbf16>
    %cst_23 = arith.constant dense<0.000000e+00> : vector<8x16xf32>
    %47 = tpu.matmul %46, %30, %cst_23 {dimension_numbers = #tpu.dot_dimension_numbers<[1], [0], [0], [1], [0, 0, 1, 1], [], []>} : vector<8x8xbf16>, vector<8x16xbf16>, vector<8x16xf32> -> vector<8x16xf32>
    %c0_24 = arith.constant 0 : index
    %c0_25 = arith.constant 0 : index
    %c32 = arith.constant 32 : index
    %48 = vector.load %arg1[%c0_24, %c0_25, %c32] : memref<1x8x256xbf16, #tpu.memory_space<vmem>>, vector<1x8x16xbf16>
    %49 = vector.shape_cast %48 : vector<1x8x16xbf16> to vector<8x16xbf16>
    %c0_26 = arith.constant 0 : index
    %c0_27 = arith.constant 0 : index
    %c96 = arith.constant 96 : index
    %50 = vector.load %arg1[%c0_26, %c0_27, %c96] : memref<1x8x256xbf16, #tpu.memory_space<vmem>>, vector<1x8x16xbf16>
    %51 = vector.shape_cast %50 : vector<1x8x16xbf16> to vector<8x16xbf16>
    %c0_28 = arith.constant 0 : index
    %c0_29 = arith.constant 0 : index
    %c160 = arith.constant 160 : index
    %52 = vector.load %arg1[%c0_28, %c0_29, %c160] : memref<1x8x256xbf16, #tpu.memory_space<vmem>>, vector<1x8x16xbf16>
    %53 = vector.shape_cast %52 : vector<1x8x16xbf16> to vector<8x16xbf16>
    %cst_30 = arith.constant 2.500000e-01 : bf16
    %54 = vector.broadcast %cst_30 : bf16 to vector<8x16xbf16>
    %55 = arith.mulf %49, %54 : vector<8x16xbf16>
    %cst_31 = arith.constant dense<0.000000e+00> : vector<8x8xf32>
    %56 = tpu.matmul %55, %51, %cst_31 {dimension_numbers = #tpu.dot_dimension_numbers<[1], [1], [0], [0], [0, 0, 1, 0], [], []>} : vector<8x16xbf16>, vector<8x16xbf16>, vector<8x8xf32> -> vector<8x8xf32>
    %57 = vector.broadcast %1 : vector<1x8xf32> to vector<8x8xf32>
    %58 = arith.addf %56, %57 : vector<8x8xf32>
    %cst_32 = arith.constant dense<0xFF800000> : vector<8xf32>
    %59 = vector.multi_reduction <maximumf>, %58, %cst_32 [1] : vector<8x8xf32> to vector<8xf32>
    %60 = vector.shape_cast %59 : vector<8xf32> to vector<8x1xf32>
    %61 = vector.broadcast %60 : vector<8x1xf32> to vector<8x8xf32>
    %62 = arith.subf %58, %61 : vector<8x8xf32>
    %63 = math.exp %62 : vector<8x8xf32>
    %cst_33 = arith.constant dense<0.000000e+00> : vector<8xf32>
    %64 = vector.multi_reduction <add>, %63, %cst_33 [1] : vector<8x8xf32> to vector<8xf32>
    %65 = vector.shape_cast %64 : vector<8xf32> to vector<8x1xf32>
    %66 = tpu.reciprocal %65 {approx = true} : vector<8x1xf32> -> vector<8x1xf32>
    %67 = vector.broadcast %66 : vector<8x1xf32> to vector<8x8xf32>
    %68 = arith.mulf %63, %67 : vector<8x8xf32>
    %69 = arith.truncf %68 : vector<8x8xf32> to vector<8x8xbf16>
    %cst_34 = arith.constant dense<0.000000e+00> : vector<8x16xf32>
    %70 = tpu.matmul %69, %53, %cst_34 {dimension_numbers = #tpu.dot_dimension_numbers<[1], [0], [0], [1], [0, 0, 1, 1], [], []>} : vector<8x8xbf16>, vector<8x16xbf16>, vector<8x16xf32> -> vector<8x16xf32>
    %c0_35 = arith.constant 0 : index
    %c0_36 = arith.constant 0 : index
    %c48 = arith.constant 48 : index
    %71 = vector.load %arg1[%c0_35, %c0_36, %c48] : memref<1x8x256xbf16, #tpu.memory_space<vmem>>, vector<1x8x16xbf16>
    %72 = vector.shape_cast %71 : vector<1x8x16xbf16> to vector<8x16xbf16>
    %c0_37 = arith.constant 0 : index
    %c0_38 = arith.constant 0 : index
    %c112 = arith.constant 112 : index
    %73 = vector.load %arg1[%c0_37, %c0_38, %c112] : memref<1x8x256xbf16, #tpu.memory_space<vmem>>, vector<1x8x16xbf16>
    %74 = vector.shape_cast %73 : vector<1x8x16xbf16> to vector<8x16xbf16>
    %c0_39 = arith.constant 0 : index
    %c0_40 = arith.constant 0 : index
    %c176 = arith.constant 176 : index
    %75 = vector.load %arg1[%c0_39, %c0_40, %c176] : memref<1x8x256xbf16, #tpu.memory_space<vmem>>, vector<1x8x16xbf16>
    %76 = vector.shape_cast %75 : vector<1x8x16xbf16> to vector<8x16xbf16>
    %cst_41 = arith.constant 2.500000e-01 : bf16
    %77 = vector.broadcast %cst_41 : bf16 to vector<8x16xbf16>
    %78 = arith.mulf %72, %77 : vector<8x16xbf16>
    %cst_42 = arith.constant dense<0.000000e+00> : vector<8x8xf32>
    %79 = tpu.matmul %78, %74, %cst_42 {dimension_numbers = #tpu.dot_dimension_numbers<[1], [1], [0], [0], [0, 0, 1, 0], [], []>} : vector<8x16xbf16>, vector<8x16xbf16>, vector<8x8xf32> -> vector<8x8xf32>
    %80 = vector.broadcast %1 : vector<1x8xf32> to vector<8x8xf32>
    %81 = arith.addf %79, %80 : vector<8x8xf32>
    %cst_43 = arith.constant dense<0xFF800000> : vector<8xf32>
    %82 = vector.multi_reduction <maximumf>, %81, %cst_43 [1] : vector<8x8xf32> to vector<8xf32>
    %83 = vector.shape_cast %82 : vector<8xf32> to vector<8x1xf32>
    %84 = vector.broadcast %83 : vector<8x1xf32> to vector<8x8xf32>
    %85 = arith.subf %81, %84 : vector<8x8xf32>
    %86 = math.exp %85 : vector<8x8xf32>
    %cst_44 = arith.constant dense<0.000000e+00> : vector<8xf32>
    %87 = vector.multi_reduction <add>, %86, %cst_44 [1] : vector<8x8xf32> to vector<8xf32>
    %88 = vector.shape_cast %87 : vector<8xf32> to vector<8x1xf32>
    %89 = tpu.reciprocal %88 {approx = true} : vector<8x1xf32> -> vector<8x1xf32>
    %90 = vector.broadcast %89 : vector<8x1xf32> to vector<8x8xf32>
    %91 = arith.mulf %86, %90 : vector<8x8xf32>
    %92 = arith.truncf %91 : vector<8x8xf32> to vector<8x8xbf16>
    %cst_45 = arith.constant dense<0.000000e+00> : vector<8x16xf32>
    %93 = tpu.matmul %92, %76, %cst_45 {dimension_numbers = #tpu.dot_dimension_numbers<[1], [0], [0], [1], [0, 0, 1, 1], [], []>} : vector<8x8xbf16>, vector<8x16xbf16>, vector<8x16xf32> -> vector<8x16xf32>
    %94 = tpu.concatenate %24, %47, %70, %93 in 1 : vector<8x16xf32>, vector<8x16xf32>, vector<8x16xf32>, vector<8x16xf32> -> vector<8x64xf32>
    %95 = arith.truncf %94 : vector<8x64xf32> to vector<8x64xbf16>
    %c0_46 = arith.constant 0 : index
    %c0_47 = arith.constant 0 : index
    %c0_48 = arith.constant 0 : index
    %96 = vector.load %arg3[%c0_46, %c0_47, %c0_48] : memref<1x8x64xbf16, #tpu.memory_space<vmem>>, vector<1x8x64xbf16>
    %97 = vector.shape_cast %96 : vector<1x8x64xbf16> to vector<8x64xbf16>
    %98 = vector.shape_cast %95 : vector<8x64xbf16> to vector<1x8x64xbf16>
    tpu.vector_store %arg3[%c0_46, %c0_47, %c0_48], %98 {strides = array<i32>} : memref<1x8x64xbf16, #tpu.memory_space<vmem>>, vector<1x8x64xbf16>,
    return
  }
  func.func @transform_0(%arg0: i32) -> (i32, i32, i32) {
    %c0_i32 = arith.constant 0 : i32
    %c0_i32_0 = arith.constant 0 : i32
    %c0_i32_1 = arith.constant 0 : i32
    return %arg0, %c0_i32, %c0_i32_0 : i32, i32, i32
  }
  func.func @transform_1(%arg0: i32) -> (i32, i32, i32) {
    %c0_i32 = arith.constant 0 : i32
    %c0_i32_0 = arith.constant 0 : i32
    %c0_i32_1 = arith.constant 0 : i32
    return %arg0, %c0_i32, %c0_i32_0 : i32, i32, i32
  }
  func.func @transform_2(%arg0: i32) -> (i32, i32, i32) {
    %c0_i32 = arith.constant 0 : i32
    %c0_i32_0 = arith.constant 0 : i32
    %c0_i32_1 = arith.constant 0 : i32
    return %arg0, %c0_i32, %c0_i32_0 : i32, i32, i32
  }
}

module attributes {stable_mosaic.version = 11 : i64} {
  func.func @_matmul_res_ln_kernel(%arg0: i32, %arg1: i32, %arg2: memref<16x128xbf16, #tpu.memory_space<vmem>>, %arg3: memref<128x64xbf16, #tpu.memory_space<vmem>>, %arg4: memref<1x64xf32, #tpu.memory_space<vmem>>, %arg5: memref<16x64xbf16, #tpu.memory_space<vmem>>, %arg6: memref<1x64xf32, #tpu.memory_space<vmem>>, %arg7: memref<1x64xf32, #tpu.memory_space<vmem>>, %arg8: memref<16x64xbf16, #tpu.memory_space<vmem>>, %arg9: memref<16x64xf32, #tpu.memory_space<vmem>>) attributes {dimension_semantics = [#tpu.dimension_semantics<parallel>, #tpu.dimension_semantics<arbitrary>], iteration_bounds = array<i64: 1, 1>, scalar_prefetch = 0 : i64, scratch_operands = 1 : i64, tpu.core_type = #tpu.core_type<tc>, window_params = [{transform_indices = @transform_0, window_bounds = array<i64: 16, 128>}, {transform_indices = @transform_1, window_bounds = array<i64: 128, 64>}, {pipeline_mode = #tpu.pipeline_mode<synchronous>, transform_indices = @transform_2, window_bounds = array<i64: 1, 64>}, {transform_indices = @transform_3, window_bounds = array<i64: 16, 64>}, {pipeline_mode = #tpu.pipeline_mode<synchronous>, transform_indices = @transform_4, window_bounds = array<i64: 1, 64>}, {pipeline_mode = #tpu.pipeline_mode<synchronous>, transform_indices = @transform_5, window_bounds = array<i64: 1, 64>}, {transform_indices = @transform_6, window_bounds = array<i64: 16, 64>}]} {
    %c0_i32 = arith.constant 0 : i32
    %0 = arith.cmpi eq, %arg1, %c0_i32 : i32
    %1 = arith.extui %0 : i1 to i32
    %c0_i32_0 = arith.constant 0 : i32
    %2 = arith.cmpi ne, %1, %c0_i32_0 : i32
    scf.if %2 {
      %cst_10 = arith.constant 0.000000e+00 : f32
      %12 = vector.broadcast %cst_10 : f32 to vector<16x64xf32>
      %c0_11 = arith.constant 0 : index
      %c0_12 = arith.constant 0 : index
      %13 = vector.load %arg9[%c0_11, %c0_12] : memref<16x64xf32, #tpu.memory_space<vmem>>, vector<16x64xf32>
      tpu.vector_store %arg9[%c0_11, %c0_12], %12 {strides = array<i32>} : memref<16x64xf32, #tpu.memory_space<vmem>>, vector<16x64xf32>,
    } else {
    }
    %c0 = arith.constant 0 : index
    %c0_1 = arith.constant 0 : index
    %3 = vector.load %arg9[%c0, %c0_1] : memref<16x64xf32, #tpu.memory_space<vmem>>, vector<16x64xf32>
    %c0_2 = arith.constant 0 : index
    %c0_3 = arith.constant 0 : index
    %4 = vector.load %arg2[%c0_2, %c0_3] : memref<16x128xbf16, #tpu.memory_space<vmem>>, vector<16x128xbf16>
    %c0_4 = arith.constant 0 : index
    %c0_5 = arith.constant 0 : index
    %5 = vector.load %arg3[%c0_4, %c0_5] : memref<128x64xbf16, #tpu.memory_space<vmem>>, vector<128x64xbf16>
    %cst = arith.constant dense<0.000000e+00> : vector<16x64xf32>
    %6 = tpu.matmul %4, %5, %cst {dimension_numbers = #tpu.dot_dimension_numbers<[1], [0], [0], [1], [0, 0, 1, 1], [], []>} : vector<16x128xbf16>, vector<128x64xbf16>, vector<16x64xf32> -> vector<16x64xf32>
    %7 = arith.addf %3, %6 : vector<16x64xf32>
    %c0_6 = arith.constant 0 : index
    %c0_7 = arith.constant 0 : index
    %8 = vector.load %arg9[%c0_6, %c0_7] : memref<16x64xf32, #tpu.memory_space<vmem>>, vector<16x64xf32>
    tpu.vector_store %arg9[%c0_6, %c0_7], %7 {strides = array<i32>} : memref<16x64xf32, #tpu.memory_space<vmem>>, vector<16x64xf32>,
    %c0_i32_8 = arith.constant 0 : i32
    %9 = arith.cmpi eq, %arg1, %c0_i32_8 : i32
    %10 = arith.extui %9 : i1 to i32
    %c0_i32_9 = arith.constant 0 : i32
    %11 = arith.cmpi ne, %10, %c0_i32_9 : i32
    scf.if %11 {
      %c0_10 = arith.constant 0 : index
      %c0_11 = arith.constant 0 : index
      %12 = vector.load %arg9[%c0_10, %c0_11] : memref<16x64xf32, #tpu.memory_space<vmem>>, vector<16x64xf32>
      %c0_12 = arith.constant 0 : index
      %c0_13 = arith.constant 0 : index
      %13 = vector.load %arg4[%c0_12, %c0_13] : memref<1x64xf32, #tpu.memory_space<vmem>>, vector<1x64xf32>
      %14 = vector.broadcast %13 : vector<1x64xf32> to vector<16x64xf32>
      %15 = arith.addf %12, %14 : vector<16x64xf32>
      %c0_14 = arith.constant 0 : index
      %c0_15 = arith.constant 0 : index
      %16 = vector.load %arg5[%c0_14, %c0_15] : memref<16x64xbf16, #tpu.memory_space<vmem>>, vector<16x64xbf16>
      %17 = arith.extf %16 : vector<16x64xbf16> to vector<16x64xf32>
      %18 = arith.addf %15, %17 : vector<16x64xf32>
      %cst_16 = arith.constant dense<0.000000e+00> : vector<16xf32>
      %19 = vector.multi_reduction <add>, %18, %cst_16 [1] : vector<16x64xf32> to vector<16xf32>
      %20 = vector.shape_cast %19 : vector<16xf32> to vector<16x1xf32>
      %cst_17 = arith.constant 6.400000e+01 : f32
      %21 = vector.broadcast %cst_17 : f32 to vector<16x1xf32>
      %22 = arith.divf %20, %21 : vector<16x1xf32>
      %23 = vector.broadcast %22 : vector<16x1xf32> to vector<16x64xf32>
      %24 = arith.subf %18, %23 : vector<16x64xf32>
      %25 = arith.mulf %24, %24 : vector<16x64xf32>
      %cst_18 = arith.constant dense<0.000000e+00> : vector<16xf32>
      %26 = vector.multi_reduction <add>, %25, %cst_18 [1] : vector<16x64xf32> to vector<16xf32>
      %27 = vector.shape_cast %26 : vector<16xf32> to vector<16x1xf32>
      %cst_19 = arith.constant 6.400000e+01 : f32
      %28 = vector.broadcast %cst_19 : f32 to vector<16x1xf32>
      %29 = arith.divf %27, %28 : vector<16x1xf32>
      %30 = vector.broadcast %22 : vector<16x1xf32> to vector<16x64xf32>
      %31 = arith.subf %18, %30 : vector<16x64xf32>
      %cst_20 = arith.constant 9.99999996E-13 : f32
      %32 = vector.broadcast %cst_20 : f32 to vector<16x1xf32>
      %33 = arith.addf %29, %32 : vector<16x1xf32>
      %34 = math.rsqrt %33 : vector<16x1xf32>
      %35 = vector.broadcast %34 : vector<16x1xf32> to vector<16x64xf32>
      %36 = arith.mulf %31, %35 : vector<16x64xf32>
      %c0_21 = arith.constant 0 : index
      %c0_22 = arith.constant 0 : index
      %37 = vector.load %arg6[%c0_21, %c0_22] : memref<1x64xf32, #tpu.memory_space<vmem>>, vector<1x64xf32>
      %38 = vector.broadcast %37 : vector<1x64xf32> to vector<16x64xf32>
      %39 = arith.mulf %36, %38 : vector<16x64xf32>
      %c0_23 = arith.constant 0 : index
      %c0_24 = arith.constant 0 : index
      %40 = vector.load %arg7[%c0_23, %c0_24] : memref<1x64xf32, #tpu.memory_space<vmem>>, vector<1x64xf32>
      %41 = vector.broadcast %40 : vector<1x64xf32> to vector<16x64xf32>
      %42 = arith.addf %39, %41 : vector<16x64xf32>
      %43 = arith.truncf %42 : vector<16x64xf32> to vector<16x64xbf16>
      %c0_25 = arith.constant 0 : index
      %c0_26 = arith.constant 0 : index
      %44 = vector.load %arg8[%c0_25, %c0_26] : memref<16x64xbf16, #tpu.memory_space<vmem>>, vector<16x64xbf16>
      tpu.vector_store %arg8[%c0_25, %c0_26], %43 {strides = array<i32>} : memref<16x64xbf16, #tpu.memory_space<vmem>>, vector<16x64xbf16>,
    } else {
    }
    return
  }
  func.func @transform_0(%arg0: i32, %arg1: i32) -> (i32, i32) {
    %c0_i32 = arith.constant 0 : i32
    return %arg0, %arg1 : i32, i32
  }
  func.func @transform_1(%arg0: i32, %arg1: i32) -> (i32, i32) {
    %c0_i32 = arith.constant 0 : i32
    %c0_i32_0 = arith.constant 0 : i32
    return %arg1, %c0_i32 : i32, i32
  }
  func.func @transform_2(%arg0: i32, %arg1: i32) -> (i32, i32) {
    %c0_i32 = arith.constant 0 : i32
    %c0_i32_0 = arith.constant 0 : i32
    %c0_i32_1 = arith.constant 0 : i32
    return %c0_i32, %c0_i32_0 : i32, i32
  }
  func.func @transform_3(%arg0: i32, %arg1: i32) -> (i32, i32) {
    %c0_i32 = arith.constant 0 : i32
    %c0_i32_0 = arith.constant 0 : i32
    return %arg0, %c0_i32 : i32, i32
  }
  func.func @transform_4(%arg0: i32, %arg1: i32) -> (i32, i32) {
    %c0_i32 = arith.constant 0 : i32
    %c0_i32_0 = arith.constant 0 : i32
    %c0_i32_1 = arith.constant 0 : i32
    return %c0_i32, %c0_i32_0 : i32, i32
  }
  func.func @transform_5(%arg0: i32, %arg1: i32) -> (i32, i32) {
    %c0_i32 = arith.constant 0 : i32
    %c0_i32_0 = arith.constant 0 : i32
    %c0_i32_1 = arith.constant 0 : i32
    return %c0_i32, %c0_i32_0 : i32, i32
  }
  func.func @transform_6(%arg0: i32, %arg1: i32) -> (i32, i32) {
    %c0_i32 = arith.constant 0 : i32
    %c0_i32_0 = arith.constant 0 : i32
    return %arg0, %c0_i32 : i32, i32
  }
}

module attributes {stable_mosaic.version = 11 : i64} {
  func.func @_matmul_bias_kernel(%arg0: i32, %arg1: i32, %arg2: i32, %arg3: memref<16x128xbf16, #tpu.memory_space<vmem>>, %arg4: memref<128x128xbf16, #tpu.memory_space<vmem>>, %arg5: memref<1x128xf32, #tpu.memory_space<vmem>>, %arg6: memref<16x128xbf16, #tpu.memory_space<vmem>>, %arg7: memref<16x128xf32, #tpu.memory_space<vmem>>) attributes {dimension_semantics = [#tpu.dimension_semantics<parallel>, #tpu.dimension_semantics<parallel>, #tpu.dimension_semantics<arbitrary>], iteration_bounds = array<i64: 1, 1, 1>, scalar_prefetch = 0 : i64, scratch_operands = 1 : i64, tpu.core_type = #tpu.core_type<tc>, window_params = [{transform_indices = @transform_0, window_bounds = array<i64: 16, 128>}, {transform_indices = @transform_1, window_bounds = array<i64: 128, 128>}, {transform_indices = @transform_2, window_bounds = array<i64: 1, 128>}, {transform_indices = @transform_3, window_bounds = array<i64: 16, 128>}]} {
    %c0_i32 = arith.constant 0 : i32
    %0 = arith.cmpi eq, %arg2, %c0_i32 : i32
    %1 = arith.extui %0 : i1 to i32
    %c0_i32_0 = arith.constant 0 : i32
    %2 = arith.cmpi ne, %1, %c0_i32_0 : i32
    scf.if %2 {
      %cst_10 = arith.constant 0.000000e+00 : f32
      %12 = vector.broadcast %cst_10 : f32 to vector<16x128xf32>
      %c0_11 = arith.constant 0 : index
      %c0_12 = arith.constant 0 : index
      %13 = vector.load %arg7[%c0_11, %c0_12] : memref<16x128xf32, #tpu.memory_space<vmem>>, vector<16x128xf32>
      tpu.vector_store %arg7[%c0_11, %c0_12], %12 {strides = array<i32>} : memref<16x128xf32, #tpu.memory_space<vmem>>, vector<16x128xf32>,
    } else {
    }
    %c0 = arith.constant 0 : index
    %c0_1 = arith.constant 0 : index
    %3 = vector.load %arg7[%c0, %c0_1] : memref<16x128xf32, #tpu.memory_space<vmem>>, vector<16x128xf32>
    %c0_2 = arith.constant 0 : index
    %c0_3 = arith.constant 0 : index
    %4 = vector.load %arg3[%c0_2, %c0_3] : memref<16x128xbf16, #tpu.memory_space<vmem>>, vector<16x128xbf16>
    %c0_4 = arith.constant 0 : index
    %c0_5 = arith.constant 0 : index
    %5 = vector.load %arg4[%c0_4, %c0_5] : memref<128x128xbf16, #tpu.memory_space<vmem>>, vector<128x128xbf16>
    %cst = arith.constant dense<0.000000e+00> : vector<16x128xf32>
    %6 = tpu.matmul %4, %5, %cst {dimension_numbers = #tpu.dot_dimension_numbers<[1], [0], [0], [1], [0, 0, 1, 1], [], []>} : vector<16x128xbf16>, vector<128x128xbf16>, vector<16x128xf32> -> vector<16x128xf32>
    %7 = arith.addf %3, %6 : vector<16x128xf32>
    %c0_6 = arith.constant 0 : index
    %c0_7 = arith.constant 0 : index
    %8 = vector.load %arg7[%c0_6, %c0_7] : memref<16x128xf32, #tpu.memory_space<vmem>>, vector<16x128xf32>
    tpu.vector_store %arg7[%c0_6, %c0_7], %7 {strides = array<i32>} : memref<16x128xf32, #tpu.memory_space<vmem>>, vector<16x128xf32>,
    %c0_i32_8 = arith.constant 0 : i32
    %9 = arith.cmpi eq, %arg2, %c0_i32_8 : i32
    %10 = arith.extui %9 : i1 to i32
    %c0_i32_9 = arith.constant 0 : i32
    %11 = arith.cmpi ne, %10, %c0_i32_9 : i32
    scf.if %11 {
      %c0_10 = arith.constant 0 : index
      %c0_11 = arith.constant 0 : index
      %12 = vector.load %arg7[%c0_10, %c0_11] : memref<16x128xf32, #tpu.memory_space<vmem>>, vector<16x128xf32>
      %c0_12 = arith.constant 0 : index
      %c0_13 = arith.constant 0 : index
      %13 = vector.load %arg5[%c0_12, %c0_13] : memref<1x128xf32, #tpu.memory_space<vmem>>, vector<1x128xf32>
      %14 = vector.broadcast %13 : vector<1x128xf32> to vector<16x128xf32>
      %15 = arith.addf %12, %14 : vector<16x128xf32>
      %cst_14 = arith.constant 5.000000e-01 : f32
      %16 = vector.broadcast %cst_14 : f32 to vector<16x128xf32>
      %17 = arith.mulf %16, %15 : vector<16x128xf32>
      %cst_15 = arith.constant 4.471500e-02 : f32
      %18 = vector.broadcast %cst_15 : f32 to vector<16x128xf32>
      %19 = arith.mulf %18, %15 : vector<16x128xf32>
      %20 = arith.mulf %19, %15 : vector<16x128xf32>
      %21 = arith.mulf %20, %15 : vector<16x128xf32>
      %22 = arith.addf %15, %21 : vector<16x128xf32>
      %cst_16 = arith.constant 0.797884583 : f32
      %23 = vector.broadcast %cst_16 : f32 to vector<16x128xf32>
      %24 = arith.mulf %23, %22 : vector<16x128xf32>
      %25 = math.tanh %24 : vector<16x128xf32>
      %cst_17 = arith.constant 1.000000e+00 : f32
      %26 = vector.broadcast %cst_17 : f32 to vector<16x128xf32>
      %27 = arith.addf %26, %25 : vector<16x128xf32>
      %28 = arith.mulf %17, %27 : vector<16x128xf32>
      %29 = arith.truncf %28 : vector<16x128xf32> to vector<16x128xbf16>
      %c0_18 = arith.constant 0 : index
      %c0_19 = arith.constant 0 : index
      %30 = vector.load %arg6[%c0_18, %c0_19] : memref<16x128xbf16, #tpu.memory_space<vmem>>, vector<16x128xbf16>
      tpu.vector_store %arg6[%c0_18, %c0_19], %29 {strides = array<i32>} : memref<16x128xbf16, #tpu.memory_space<vmem>>, vector<16x128xbf16>,
    } else {
    }
    return
  }
  func.func @transform_0(%arg0: i32, %arg1: i32, %arg2: i32) -> (i32, i32) {
    %c0_i32 = arith.constant 0 : i32
    return %arg0, %arg2 : i32, i32
  }
  func.func @transform_1(%arg0: i32, %arg1: i32, %arg2: i32) -> (i32, i32) {
    %c0_i32 = arith.constant 0 : i32
    return %arg2, %arg1 : i32, i32
  }
  func.func @transform_2(%arg0: i32, %arg1: i32, %arg2: i32) -> (i32, i32) {
    %c0_i32 = arith.constant 0 : i32
    %c0_i32_0 = arith.constant 0 : i32
    return %c0_i32, %arg1 : i32, i32
  }
  func.func @transform_3(%arg0: i32, %arg1: i32, %arg2: i32) -> (i32, i32) {
    %c0_i32 = arith.constant 0 : i32
    return %arg0, %arg1 : i32, i32
  }
}

module attributes {stable_mosaic.version = 11 : i64} {
  func.func @_pooler_classifier_kernel(%arg0: memref<8x64xbf16, #tpu.memory_space<vmem>>, %arg1: memref<64x64xbf16, #tpu.memory_space<vmem>>, %arg2: memref<1x64xf32, #tpu.memory_space<vmem>>, %arg3: memref<64x128xbf16, #tpu.memory_space<vmem>>, %arg4: memref<1x128xf32, #tpu.memory_space<vmem>>, %arg5: memref<8x128xf32, #tpu.memory_space<vmem>>) attributes {dimension_semantics = [], scalar_prefetch = 0 : i64, scratch_operands = 0 : i64, tpu.core_type = #tpu.core_type<tc>} {
    %c0 = arith.constant 0 : index
    %c0_0 = arith.constant 0 : index
    %0 = vector.load %arg0[%c0, %c0_0] : memref<8x64xbf16, #tpu.memory_space<vmem>>, vector<8x64xbf16>
    %c0_1 = arith.constant 0 : index
    %c0_2 = arith.constant 0 : index
    %1 = vector.load %arg1[%c0_1, %c0_2] : memref<64x64xbf16, #tpu.memory_space<vmem>>, vector<64x64xbf16>
    %cst = arith.constant dense<0.000000e+00> : vector<8x64xf32>
    %2 = tpu.matmul %0, %1, %cst {dimension_numbers = #tpu.dot_dimension_numbers<[1], [0], [0], [1], [0, 0, 1, 1], [], []>} : vector<8x64xbf16>, vector<64x64xbf16>, vector<8x64xf32> -> vector<8x64xf32>
    %c0_3 = arith.constant 0 : index
    %c0_4 = arith.constant 0 : index
    %3 = vector.load %arg2[%c0_3, %c0_4] : memref<1x64xf32, #tpu.memory_space<vmem>>, vector<1x64xf32>
    %4 = vector.broadcast %3 : vector<1x64xf32> to vector<8x64xf32>
    %5 = arith.addf %2, %4 : vector<8x64xf32>
    %6 = math.tanh %5 : vector<8x64xf32>
    %7 = arith.truncf %6 : vector<8x64xf32> to vector<8x64xbf16>
    %c0_5 = arith.constant 0 : index
    %c0_6 = arith.constant 0 : index
    %8 = vector.load %arg3[%c0_5, %c0_6] : memref<64x128xbf16, #tpu.memory_space<vmem>>, vector<64x128xbf16>
    %cst_7 = arith.constant dense<0.000000e+00> : vector<8x128xf32>
    %9 = tpu.matmul %7, %8, %cst_7 {dimension_numbers = #tpu.dot_dimension_numbers<[1], [0], [0], [1], [0, 0, 1, 1], [], []>} : vector<8x64xbf16>, vector<64x128xbf16>, vector<8x128xf32> -> vector<8x128xf32>
    %c0_8 = arith.constant 0 : index
    %c0_9 = arith.constant 0 : index
    %10 = vector.load %arg4[%c0_8, %c0_9] : memref<1x128xf32, #tpu.memory_space<vmem>>, vector<1x128xf32>
    %11 = vector.broadcast %10 : vector<1x128xf32> to vector<8x128xf32>
    %12 = arith.addf %9, %11 : vector<8x128xf32>
    %c0_10 = arith.constant 0 : index
    %c0_11 = arith.constant 0 : index
    %13 = vector.load %arg5[%c0_10, %c0_11] : memref<8x128xf32, #tpu.memory_space<vmem>>, vector<8x128xf32>
    tpu.vector_store %arg5[%c0_10, %c0_11], %12 {strides = array<i32>} : memref<8x128xf32, #tpu.memory_space<vmem>>, vector<8x128xf32>,
    return
  }
}

</mosaic_0001>

<bundles_post_ra>
// kernel: bert_class_forward.12
= control target key start
LH: loop header
LB: loop body
LE: loop exit
PB: predicated region body
PF: predicated region fallthrough
CT: control target
= control target key end

     0   :  { %vm16_vm0 = vcmask 523264   ;;  %vm70_vm1 = vcmask 519168   ;;  %s129_s0 = inlined_call_operand.vmem [shape: f32[16,64], index: 0, kind: input, shape index: {}]   ;;  %s130_s1 = inlined_call_operand.vmem [shape: f32[1,64], index: 1, kind: input, shape index: {}]   ;;  %s131_s2 = inlined_call_operand.vmem [shape: f32[1,64], index: 2, kind: input, shape index: {}]   ;;  %s132_s3 = inlined_call_operand.vmem [shape: bf16[16,64], index: 3, kind: output, shape index: {}]  }
   0x1   :  { %v14_v0 = vld [vmem:[%s129_s0] sm:$0xff]  ;;  %v15_v1 = vld [vmem:[%s129_s0 + $0x8] sm:$0xff] }
   0x2   :  { %v17_v2 = vsel %vm16_vm0, %v14_v0, 0.0  ;;  %v20_v3 = vsel %vm16_vm0, %v15_v1, 0.0  ;;  %v77_v21 = vld [vmem:[%s130_s1] ss:$0 sm:$0xff] }
   0x3   :  { %18 = vadd.xlane.f32.xlu0 %v17_v2  ;;  %v78_v23 = vld [vmem:[%s131_s2] ss:$0 sm:$0xff] }
   0x7   :  { %21 = vadd.xlane.f32.xlu0 %v20_v3 }
  0x8c   :  { %v19_v4 = vpop.xlane.xlu0 %18 }
  0x8d   :  { %v24_v5 = vmul.f32 0.015625, %v19_v4 }
  0x8f   :  { %v26_v6 = vsub.f32 %v14_v0, %v24_v5 }
  0x90   :  { %v22_v7 = vpop.xlane.xlu0 %21 }
  0x91   :  { %v25_v8 = vmul.f32 0.015625, %v22_v7  ;;  %v28_v9 = vmul.f32 %v26_v6, %v26_v6 }
  0x93   :  { %v27_v10 = vsub.f32 %v15_v1, %v25_v8  ;;  %v30_v11 = vsel %vm16_vm0, %v28_v9, 0.0 }
  0x94   :  { %31 = vadd.xlane.f32.xlu1 %v30_v11 }
  0x95   :  { %v29_v12 = vmul.f32 %v27_v10, %v27_v10 }
  0x97   :  { %v33_v13 = vsel %vm16_vm0, %v29_v12, 0.0 }
  0x98   :  { %34 = vadd.xlane.f32.xlu1 %v33_v13 }
 0x11d   :  { %v32_v14 = vpop.xlane.xlu1 %31 }
 0x11e   :  { %v36_v15 = vmul.f32 0.015625, %v32_v14 }
 0x120   :  { %v38_v16 = vadd.f32 1e-12, %v36_v15 }
 0x121   :  { %v35_v17 = vpop.xlane.xlu1 %34 }
 0x122   :  { %83 = vrsqrt.f32 %v38_v16  ;;  %v37_v18 = vmul.f32 0.015625, %v35_v17 }
 0x124   :  { %v39_v19 = vadd.f32 1e-12, %v37_v18 }
 0x126   :  { %85 = vrsqrt.f32 %v39_v19 }
 0x12f   :  { %v84_v20 = vpop.eup %83 }
 0x130   :  { %v42_v22 = vmul.f32 %v84_v20, %v26_v6 }
 0x132   :  { %v51_v24 = vmul.f32 %v77_v21, %v42_v22 }
 0x133   :  { %v86_v25 = vpop.eup %85 }
 0x134   :  { %v60_v26 = vadd.f32 %v78_v23, %v51_v24  ;;  %v43_v27 = vmul.f32 %v86_v25, %v27_v10 }
 0x136   :  { %v81_v28 = vpack.c.bf16 %v60_v26, %v60_v26  ;;  %v52_v29 = vmul.f32 %v77_v21, %v43_v27 }
 0x138   :  { %71 = vst.msk [vmem:[%s132_s3] sm:$0xf] %vm70_vm1, %v81_v28  ;;  %v61_v30 = vadd.f32 %v78_v23, %v52_v29 }
 0x13a   :  { %v82_v31 = vpack.c.bf16 %v61_v30, %v61_v30 }
 0x13c   :  { %72 = vst.msk [vmem:[%s132_s3 + $0x4] sm:$0xf] %vm70_vm1, %v82_v31 }

// kernel: bert_class_forward.13
= control target key start
LH: loop header
LB: loop body
LE: loop exit
PB: predicated region body
PF: predicated region fallthrough
CT: control target
= control target key end

     0   :  { %v270_v1 = vmov 0   ;;  %v191_v18 = vlaneseq  ;;  %s351_s1 = inlined_call_operand.vmem [shape: bf16[128,256], index: 1, kind: input, shape index: {}]   ;;  %s352_s0 = inlined_call_operand.vmem [shape: bf16[16,128], index: 0, kind: input, shape index: {}]   ;;  %s353_s2 = inlined_call_operand.vmem [shape: f32[1,256], index: 2, kind: input, shape index: {}]   ;;  %s354_s3 = inlined_call_operand.vmem [shape: bf16[16,256], index: 3, kind: output, shape index: {}]  }
   0x1   :  { %v245_v0 = vld [vmem:[%s351_s1 + $0x74] ss:$8 sps:$4 sm:$0xff]   ;;  %163 = vmatprep.mubr.bf16.mxu0 %v270_v1  ;;  %v247_v2 = vld [vmem:[%s351_s1 + $0x70] ss:$8 sps:$4 sm:$0xff]   ;;  %v248_v3 = vld [vmem:[%s351_s1 + $0x64] ss:$8 sps:$4 sm:$0xff]  }
   0x2   :  { %131 = vmatprep.subr.bf16.mxu0 %v245_v0  ;;  %v250_v4 = vld [vmem:[%s351_s1 + $0x60] ss:$8 sps:$4 sm:$0xff]   ;;  %v251_v5 = vld [vmem:[%s351_s1 + $0x54] ss:$8 sps:$4 sm:$0xff]   ;;  %v253_v6 = vld [vmem:[%s351_s1 + $0x50] ss:$8 sps:$4 sm:$0xff]  }
   0x3   :  { %132 = vmatpush1.bf16.msra.mxu0 %v247_v2  ;;  %v254_v7 = vld [vmem:[%s351_s1 + $0x44] ss:$8 sps:$4 sm:$0xff]   ;;  %v256_v8 = vld [vmem:[%s351_s1 + $0x40] ss:$8 sps:$4 sm:$0xff]   ;;  %v257_v9 = vld [vmem:[%s351_s1 + $0x34] ss:$8 sps:$4 sm:$0xff]  }
   0x4   :  { %133 = vmatprep.subr.bf16.mxu0 %v248_v3  ;;  %v259_v10 = vld [vmem:[%s351_s1 + $0x30] ss:$8 sps:$4 sm:$0xff]   ;;  %v260_v11 = vld [vmem:[%s351_s1 + $0x24] ss:$8 sps:$4 sm:$0xff]   ;;  %v262_v12 = vld [vmem:[%s351_s1 + $0x20] ss:$8 sps:$4 sm:$0xff]  }
   0x5   :  { %v263_v13 = vld [vmem:[%s351_s1 + $0x14] ss:$8 sps:$4 sm:$0xff]   ;;  %v265_v14 = vld [vmem:[%s351_s1 + $0x10] ss:$8 sps:$4 sm:$0xff]   ;;  %v266_v15 = vld [vmem:[%s351_s1 + $0x4] ss:$8 sps:$4 sm:$0xff]  }
   0x6   :  { %v268_v16 = vld [vmem:[%s351_s1] ss:$8 sps:$4 sm:$0xff]   ;;  %v192_v19 = vshrl.u32 %v191_v18, 7 }
   0x7   :  { %134 = vmatpush1.bf16.msra.mxu0 %v250_v4  ;;  %v269_v17 = vld [vmem:[%s352_s0] sm:$0xff]  }
   0x8   :  { %135 = vmatprep.subr.bf16.mxu0 %v251_v5  ;;  %v193_v20 = vsub.s32 0, %v192_v19  ;;  %v197_v21 = vsub.s32 1, %v192_v19  ;;  %v189_v22 = vld [vmem:[%s353_s2] sm:$0x3] }
   0xa   :  { %v194_v23 = vrot.slane %v189_v22, %v193_v20  ;;  %v198_v24 = vrot.slane %v189_v22, %v197_v21 }
   0xb   :  { %136 = vmatpush1.bf16.msra.mxu0 %v253_v6 }
   0xc   :  { %137 = vmatprep.subr.bf16.mxu0 %v254_v7 }
   0xf   :  { %138 = vmatpush1.bf16.msra.mxu0 %v256_v8 }
  0x10   :  { %139 = vmatprep.subr.bf16.mxu0 %v257_v9 }
  0x13   :  { %140 = vmatpush1.bf16.msra.mxu0 %v259_v10 }
  0x14   :  { %141 = vmatprep.subr.bf16.mxu0 %v260_v11 }
  0x17   :  { %142 = vmatpush1.bf16.msra.mxu0 %v262_v12 }
  0x18   :  { %143 = vmatprep.subr.bf16.mxu0 %v263_v13 }
  0x1b   :  { %144 = vmatpush1.bf16.msra.mxu0 %v265_v14 }
  0x1c   :  { %145 = vmatprep.subr.bf16.mxu0 %v266_v15 }
  0x1f   :  { %146 = vmatpush1.bf16.msra.mxu0 %v268_v16 }
  0x22   :  { %164 = vmatmul.mubr.bf16.vlgmr.msra.gmra.mxu0 %v269_v17 }
  0xe2   :  { %v165_v25 = vpop.f32.mrf.mxu0 }
  0xe3   :  { %v201_v27 = vadd.f32 %v194_v23, %v165_v25 }
  0xe4   :  { %v167_v26 = vpop.f32.mrf.mxu0 }
  0xe5   :  { %v202_v28 = vadd.f32 %v198_v24, %v167_v26 }
  0xe6   :  { %v169_v29 = vpop.f32.mrf.mxu0 }
  0xe7   :  { %v242_v30 = vpack.c.bf16 %v202_v28, %v201_v27  ;;  %v203_v32 = vadd.f32 %v194_v23, %v169_v29 }
  0xe8   :  { %v171_v31 = vpop.f32.mrf.mxu0 }
  0xe9   :  { %217 = vst [vmem:[%s354_s3] sm:$0xff] %v242_v30  ;;  %v204_v33 = vadd.f32 %v198_v24, %v171_v31 }
  0xeb   :  { %v243_v34 = vpack.c.bf16 %v204_v33, %v203_v32 }
  0xed   :  { %218 = vst [vmem:[%s354_s3 + $0x8] sm:$0xff] %v243_v34 }

// kernel: bert_class_forward.14
= control target key start
LH: loop header
LB: loop body
LE: loop exit
PB: predicated region body
PF: predicated region fallthrough
CT: control target
= control target key end

     0   :  { %s852_s9 = smov 0   ;;  %s956_s0 = inlined_call_operand.vmem [shape: bf16[2,8,256], index: 0, kind: input, shape index: {}]   ;;  %s957_s1 = inlined_call_operand.vmem [shape: f32[2,1,8], index: 1, kind: input, shape index: {}]   ;;  %s958_s2 = inlined_call_operand.vmem [shape: bf16[2,8,64], index: 2, kind: output, shape index: {}]  }
   0x1 LB: > { %s698_s10 = sadd.s32 4294967295, %s826_s9   ;;  %p702_p0 = scmp.ge.s32.totalorder %s826_s9, 1  ;;  %s826_s9 = sphi %s852_s9, %s12_s9  }
   0x2   : > { %p120_p1 = scmp.lt.s32.totalorder %s826_s9, 3 }
   0x4   : > { %p121_p2 = pnand %p702_p0, %p120_p1 }
   0x5   : > { %p144_p3 = scmp.lt.s32.totalorder (!%p121_p2), %s698_s10, 1  ;;  %s830_s15 = smov (!%p121_p2), 64  }
   0x6   : > { %124 = sbr.rel (%p121_p2) target bundleno = 1494 (0x5d6), region = 28  ;;  %s831_s16 = smov (!%p121_p2), 48  }
   0x7   : > { %s832_s20 = smov (!%p121_p2), 80   ;;  %s833_s21 = smov (!%p121_p2), 112  }
   0x8   : > { %s834_s22 = smov (!%p121_p2), 32   ;;  %s835_s23 = smov (!%p121_p2), 96  }
   0x9   : > { %s836_s24 = smov (!%p121_p2), 16  }
   0xb   : > { %v828_v0 = vmov 0.0   ;;  %vm829_vm0 = vmmov 0   ;;  %s960_s10 = smov (!%p144_p3, %s698_s10), 1  ;;  %vm173_vm1 = vcmask 130048   ;;  %vm220_vm2 = vcmask 64512  }
   0xc   : > { %737 = vmatprep.subr.bf16.mxu0 %v828_v0  ;;  %739 = vmatprep.mubr.msk.bf16.mxu0 %vm829_vm0, %v828_v0  ;;  %s720_s11 = sshll.u32 %s960_s10, 3  ;;  %s151_s19 = scalar_lea.vmem %s957_s1, %s960_s10  ;;  %vm236_vm3 = vcmask 1043456   ;;  %vm629_vm4 = vcmask 261120   ;;  %vm631_vm5 = vcmask 392192   ;;  %vm634_vm6 = vcmask 519168  }
   0xd   : > { %743 = vmatprep.subr.bf16.mxu1 %v828_v0  ;;  %745 = vmatprep.mubr.msk.bf16.mxu1 %vm829_vm0, %v828_v0  ;;  %s872_s14 = scalar_lea.vmem %s956_s0, %s720_s11  ;;  %v885_v6 = vld [vmem:[%s151_s19] ss:$0 sm:$0xff]  ;;  %s705_s25 = sshll.u32 %s960_s10, 2 }
   0xe   : > { %v159_v1 = vld [vmem:[%s872_s14] sm:$0xf]  ;;  %v892_v19 = vld [vmem:[%s872_s14 + $0x4] sm:$0xf]  ;;  %s155_s28 = scalar_lea.vmem %s958_s2, %s705_s25 }
   0xf   : > { %v707_v2 = vcombine.low %v159_v1, %v159_v1  ;;  %v161_v5 = vmul.bf16 1048592000, %v159_v1  ;;  %v238_v20 = vsel %vm236_vm3, %v892_v19, 0  ;;  %v712_v56 = vcombine.low %v892_v19, %v892_v19 }
  0x10   : > { %744 = vmatpush3.bf16.msra.mxu1 %v238_v20 }
  0x11   : > { %171 = vrot.lane.b32.xlu0 %v707_v2, %s830_s15  ;;  %285 = vrot.lane.b32.xlu1 %v707_v2, %s831_s16  ;;  %v710_v13 = vcombine.low %v161_v5, %v161_v5 }
  0x12   : > { %749 = vmatprep.subr.bf16.mxu1 %v828_v0 }
  0x83   : > { %v172_v3 = vpop.permute.xlu0 %171  ;;  %v286_v21 = vpop.permute.xlu1 %285 }
  0x84   : > { %v178_v4 = vsel %vm173_vm1, %v172_v3, 0  ;;  %v291_v28 = vsel %vm173_vm1, %v286_v21, 0 }
  0x85   : > { %738 = vmatpush3.bf16.xpose.msra.mxu0 %v178_v4 }
  0x86   : > { %755 = vmatprep.subr.bf16.mxu0 %v828_v0 }
  0x8c   : > { %740 = vmatmul.mubr.msk.bf16.vlgmr.msra.gmra.mxu0 %vm173_vm1, %v161_v5 }
  0x8d   : > { %757 = vmatprep.mubr.msk.bf16.mxu0 %vm829_vm0, %v828_v0 }
 0x14c   : > { %v214_v7 = vpop.f32.mrf.mxu0 }
 0x14d   : > { %v215_v8 = vadd.f32 %v885_v6, %v214_v7 }
 0x14e   : > { %v741_v9 = vpop.f32.mrf.mxu0 }
 0x14f   : > { %v221_v10 = vsel %vm220_vm2, %v215_v8, -inf }
 0x150   : > { %222 = vmax.xlane.f32.xlu0 %v221_v10  ;;  %v217_v11 = vpop.f32.mrf.mxu0 }
 0x152   : > { %v742_v12 = vpop.f32.mrf.mxu0 }
 0x166   : > { %506 = vrot.lane.b32.xlu0 %v710_v13, %s832_s20 }
 0x1d9   : > { %v223_v14 = vpop.xlane.xlu0 %222 }
 0x1da   : > { %v224_v15 = vsub.f32 %v215_v8, %v223_v14 }
 0x1dc   : > { %v225_v16 = vmul.f32 1.442695, %v224_v15 }
 0x1dd   : > { %v507_v33 = vpop.permute.xlu0 %506 }
 0x1de   : > { %804 = vpow2.f32 %v225_v16 }
 0x1eb   : > { %v805_v17 = vpop.eup %804 }
 0x1ec   : > { %v227_v18 = vsel %vm220_vm2, %v805_v17, 0.0 }
 0x1ed   : > { %228 = vadd.xlane.f32.xlu1 %v227_v18 }
 0x1fe   : > { %283 = vrot.lane.b32.xlu1 %v710_v13, %s833_s21 }
 0x202   : > { %398 = vrot.lane.b32.xlu1 %v707_v2, %s834_s22 }
 0x206   : > { %396 = vrot.lane.b32.xlu1 %v710_v13, %s835_s23 }
 0x20a   : > { %508 = vrot.lane.b32.xlu1 %v707_v2, %s836_s24 }
 0x276   : > { %v229_v22 = vpop.xlane.xlu1 %228 }
 0x277   : > { %806 = vrcp.f32 %v229_v22 }
 0x27a   : > { %v284_v23 = vpop.permute.xlu1 %283 }
 0x27e   : > { %v399_v27 = vpop.permute.xlu1 %398 }
 0x27f   : > { %v404_v30 = vsel %vm173_vm1, %v399_v27, 0 }
 0x282   : > { %v397_v29 = vpop.permute.xlu1 %396 }
 0x284   : > { %v807_v24 = vpop.eup %806 }
 0x285   : > { %v231_v25 = vmul.f32 %v807_v24, %v805_v17 }
 0x286   : > { %v509_v31 = vpop.permute.xlu1 %508 }
 0x287   : > { %v232_v26 = vpack.c.bf16 %v231_v25, %v231_v25  ;;  %v514_v32 = vsel %vm173_vm1, %v509_v31, 0 }
 0x289   : > { %746 = vmatmul.mubr.msk.bf16.vlgmr.msra.gmra.mxu1 %vm220_vm2, %v232_v26 }
 0x28a   : > { %750 = vmatpush3.bf16.xpose.msra.mxu1 %v291_v28  ;;  %751 = vmatprep.mubr.msk.bf16.mxu1 %vm829_vm0, %v828_v0 }
 0x28b   : > { %761 = vmatprep.subr.bf16.mxu1 %v828_v0 }
 0x291   : > { %752 = vmatmul.mubr.msk.bf16.vlgmr.msra.gmra.mxu1 %vm173_vm1, %v284_v23 }
 0x292   : > { %762 = vmatpush3.bf16.xpose.msra.mxu1 %v404_v30  ;;  %763 = vmatprep.mubr.msk.bf16.mxu1 %vm829_vm0, %v828_v0 }
 0x293   : > { %773 = vmatprep.subr.bf16.mxu1 %v828_v0 }
 0x299   : > { %764 = vmatmul.mubr.msk.bf16.vlgmr.msra.gmra.mxu1 %vm173_vm1, %v397_v29 }
 0x29a   : > { %774 = vmatpush3.bf16.xpose.msra.mxu1 %v514_v32  ;;  %775 = vmatprep.mubr.msk.bf16.mxu1 %vm829_vm0, %v828_v0 }
 0x2a1   : > { %776 = vmatmul.mubr.msk.bf16.vlgmr.msra.gmra.mxu1 %vm173_vm1, %v507_v33 }
 0x349   : > { %v916_v34 = vpop.f32.mrf.mxu1 }
 0x34b   : > { %v747_v35 = vpop.f32.mrf.mxu1 }
 0x34d   : > { %v277_v36 = vpop.f32.mrf.mxu1 }
 0x34f   : > { %v748_v37 = vpop.f32.mrf.mxu1 }
 0x351   : > { %v327_v38 = vpop.f32.mrf.mxu1 }
 0x352   : > { %v328_v39 = vadd.f32 %v885_v6, %v327_v38 }
 0x353   : > { %v753_v40 = vpop.f32.mrf.mxu1 }
 0x354   : > { %v333_v41 = vsel %vm220_vm2, %v328_v39, -inf }
 0x355   : > { %334 = vmax.xlane.f32.xlu1 %v333_v41  ;;  %v330_v42 = vpop.f32.mrf.mxu1 }
 0x357   : > { %v754_v43 = vpop.f32.mrf.mxu1 }
 0x359   : > { %v440_v44 = vpop.f32.mrf.mxu1 }
 0x35a   : > { %v441_v45 = vadd.f32 %v885_v6, %v440_v44 }
 0x35b   : > { %v765_v46 = vpop.f32.mrf.mxu1 }
 0x35c   : > { %v446_v47 = vsel %vm220_vm2, %v441_v45, -inf }
 0x35d   : > { %447 = vmax.xlane.f32.xlu0 %v446_v47  ;;  %v443_v48 = vpop.f32.mrf.mxu1 }
 0x35f   : > { %v766_v49 = vpop.f32.mrf.mxu1 }
 0x361   : > { %v550_v50 = vpop.f32.mrf.mxu1 }
 0x362   : > { %v551_v51 = vadd.f32 %v885_v6, %v550_v50 }
 0x363   : > { %v777_v52 = vpop.f32.mrf.mxu1 }
 0x364   : > { %v556_v53 = vsel %vm220_vm2, %v551_v51, -inf }
 0x365   : > { %557 = vmax.xlane.f32.xlu1 %v556_v53  ;;  %v553_v54 = vpop.f32.mrf.mxu1 }
 0x367   : > { %v778_v55 = vpop.f32.mrf.mxu1 }
 0x373   : > { %348 = vrot.lane.b32.xlu0 %v712_v56, %s833_s21 }
 0x376   : > { %458 = vrot.lane.b32.xlu1 %v712_v56, %s835_s23 }
 0x3de   : > { %v335_v57 = vpop.xlane.xlu1 %334 }
 0x3df   : > { %v336_v58 = vsub.f32 %v328_v39, %v335_v57 }
 0x3e1   : > { %v337_v59 = vmul.f32 1.442695, %v336_v58 }
 0x3e3   : > { %808 = vpow2.f32 %v337_v59 }
 0x3e6   : > { %v448_v60 = vpop.xlane.xlu0 %447 }
 0x3e7   : > { %v449_v61 = vsub.f32 %v441_v45, %v448_v60 }
 0x3e9   : > { %v450_v62 = vmul.f32 1.442695, %v449_v61 }
 0x3ea   : > { %v349_v9 = vpop.permute.xlu0 %348 }
 0x3eb   : > { %810 = vpow2.f32 %v450_v62  ;;  %v354_v10 = vsel %vm236_vm3, %v349_v9, 0 }
 0x3ec   : > { %756 = vmatpush3.bf16.msra.mxu0 %v354_v10 }
 0x3ed   : > { %767 = vmatprep.subr.bf16.mxu0 %v828_v0 }
 0x3ee   : > { %v558_v63 = vpop.xlane.xlu1 %557 }
 0x3ef   : > { %v559_v1 = vsub.f32 %v551_v51, %v558_v63 }
 0x3f0   : > { %v809_v2 = vpop.eup %808 }
 0x3f1   : > { %v560_v3 = vmul.f32 1.442695, %v559_v1  ;;  %v339_v4 = vsel %vm220_vm2, %v809_v2, 0.0 }
 0x3f2   : > { %340 = vadd.xlane.f32.xlu1 %v339_v4  ;;  %v459_v11 = vpop.permute.xlu1 %458 }
 0x3f3   : > { %812 = vpow2.f32 %v560_v3  ;;  %v464_v18 = vsel %vm236_vm3, %v459_v11, 0 }
 0x3f8   : > { %v811_v5 = vpop.eup %810 }
 0x3f9   : > { %v452_v6 = vsel %vm220_vm2, %v811_v5, 0.0 }
 0x3fa   : > { %453 = vadd.xlane.f32.xlu1 %v452_v6 }
 0x400   : > { %v813_v7 = vpop.eup %812 }
 0x401   : > { %v562_v8 = vsel %vm220_vm2, %v813_v7, 0.0 }
 0x402   : > { %563 = vadd.xlane.f32.xlu1 %v562_v8 }
 0x413   : > { %568 = vrot.lane.b32.xlu1 %v712_v56, %s832_s20 }
 0x47b   : > { %v341_v12 = vpop.xlane.xlu1 %340 }
 0x47c   : > { %814 = vrcp.f32 %v341_v12 }
 0x483   : > { %v454_v13 = vpop.xlane.xlu1 %453 }
 0x484   : > { %816 = vrcp.f32 %v454_v13 }
 0x489   : > { %v815_v14 = vpop.eup %814 }
 0x48a   : > { %v343_v15 = vmul.f32 %v815_v14, %v809_v2 }
 0x48b   : > { %v564_v16 = vpop.xlane.xlu1 %563 }
 0x48c   : > { %818 = vrcp.f32 %v564_v16  ;;  %v344_v17 = vpack.c.bf16 %v343_v15, %v343_v15 }
 0x48e   : > { %758 = vmatmul.mubr.msk.bf16.vlgmr.msra.gmra.mxu0 %vm220_vm2, %v344_v17 }
 0x48f   : > { %768 = vmatpush3.bf16.msra.mxu0 %v464_v18  ;;  %769 = vmatprep.mubr.msk.bf16.mxu0 %vm829_vm0, %v828_v0  ;;  %v569_v20 = vpop.permute.xlu1 %568 }
 0x490   : > { %779 = vmatprep.subr.bf16.mxu0 %v828_v0  ;;  %v574_v22 = vsel %vm236_vm3, %v569_v20, 0 }
 0x491   : > { %v817_v19 = vpop.eup %816 }
 0x492   : > { %v456_v21 = vmul.f32 %v817_v19, %v811_v5 }
 0x494   : > { %v457_v23 = vpack.c.bf16 %v456_v21, %v456_v21 }
 0x496   : > { %770 = vmatmul.mubr.msk.bf16.vlgmr.msra.gmra.mxu0 %vm220_vm2, %v457_v23 }
 0x497   : > { %780 = vmatpush3.bf16.msra.mxu0 %v574_v22  ;;  %781 = vmatprep.mubr.msk.bf16.mxu0 %vm829_vm0, %v828_v0 }
 0x499   : > { %v819_v24 = vpop.eup %818 }
 0x49a   : > { %v566_v25 = vmul.f32 %v819_v24, %v813_v7 }
 0x49c   : > { %v567_v26 = vpack.c.bf16 %v566_v25, %v566_v25 }
 0x49e   : > { %782 = vmatmul.mubr.msk.bf16.vlgmr.msra.gmra.mxu0 %vm220_vm2, %v567_v26 }
 0x54e   : > { %v390_v27 = vpop.f32.mrf.mxu0 }
 0x54f   : > { %617 = vrot.lane.b32.xlu0 %v390_v27, %s836_s24 }
 0x550   : > { %v759_v28 = vpop.f32.mrf.mxu0 }
 0x552   : > { %v393_v29 = vpop.f32.mrf.mxu0 }
 0x554   : > { %v760_v30 = vpop.f32.mrf.mxu0 }
 0x556   : > { %v500_v31 = vpop.f32.mrf.mxu0 }
 0x557   : > { %621 = vrot.lane.b32.xlu1 %v500_v31, %s834_s22 }
 0x558   : > { %v771_v32 = vpop.f32.mrf.mxu0 }
 0x55a   : > { %v503_v33 = vpop.f32.mrf.mxu0 }
 0x55c   : > { %v772_v35 = vpop.f32.mrf.mxu0 }
 0x55e   : > { %v610_v36 = vpop.f32.mrf.mxu0 }
 0x55f   : > { %625 = vrot.lane.b32.xlu0 %v610_v36, %s831_s16 }
 0x560   : > { %v783_v0 = vpop.f32.mrf.mxu0 }
 0x562   : > { %v613_v37 = vpop.f32.mrf.mxu0 }
 0x564   : > { %v784_v38 = vpop.f32.mrf.mxu0 }
 0x5c1   : > { %v618_v39 = vpop.permute.xlu0 %617 }
 0x5c2   : > { %v628_v41 = vsel %vm173_vm1, %v916_v34, %v618_v39 }
 0x5c9   : > { %v622_v40 = vpop.permute.xlu1 %621 }
 0x5ca   : > { %v630_v42 = vsel %vm629_vm4, %v628_v41, %v622_v40 }
 0x5d1   : > { %v626_v43 = vpop.permute.xlu0 %625 }
 0x5d2   : > { %v632_v44 = vsel %vm631_vm5, %v630_v42, %v626_v43 }
 0x5d3   : > { %v633_v45 = vpack.c.bf16 %v632_v44, %v632_v44 }
 0x5d5   : > { %635 = vst.msk [vmem:[%s155_s28] sm:$0xf] %vm634_vm6, %v633_v45 }
 0x5d6 PF: > { %s12_s9 = sadd.s32 1, %s826_s9  }
 0x5d7   : > { %p9_p4 = scmp.ge.s32.totalorder %s12_s9, 4  }
 0x5d9   :  { %11 = sbr.rel (!%p9_p4) target bundleno = 1 (0x1), region = 61 }

// kernel: bert_class_forward.15
= control target key start
LH: loop header
LB: loop body
LE: loop exit
PB: predicated region body
PF: predicated region fallthrough
CT: control target
= control target key end

     0   :  { %vm28_vm0 = vcmask 523264   ;;  %v295_v0 = vmov 0.0   ;;  %vm296_vm1 = vmmov 0   ;;  %vm224_vm2 = vcmask 519168   ;;  %s385_s1 = inlined_call_operand.vmem [shape: bf16[128,64], index: 1, kind: input, shape index: {}]   ;;  %s386_s0 = inlined_call_operand.vmem [shape: bf16[16,128], index: 0, kind: input, shape index: {}]   ;;  %s387_s3 = inlined_call_operand.vmem [shape: bf16[16,64], index: 3, kind: input, shape index: {}]   ;;  %s388_s2 = inlined_call_operand.vmem [shape: f32[1,64], index: 2, kind: input, shape index: {}]   ;;  %s389_s4 = inlined_call_operand.vmem [shape: f32[1,64], index: 4, kind: input, shape index: {}]   ;;  %s390_s5 = inlined_call_operand.vmem [shape: f32[1,64], index: 5, kind: input, shape index: {}]   ;;  %s391_s6 = inlined_call_operand.vmem [shape: bf16[16,64], index: 6, kind: output, shape index: {}]  }
   0x1   :  { %260 = vmatprep.subr.bf16.mxu0 %v295_v0  ;;  %v282_v1 = vld [vmem:[%s385_s1 + $0x38] sm:$0xff]   ;;  %276 = vmatprep.mubr.msk.bf16.mxu0 %vm296_vm1, %v295_v0  ;;  %29 = vst.msk [vmem:[#allocation2] sm:$0xff] %vm28_vm0, %v295_v0  ;;  %30 = vst.msk [vmem:[#allocation2 + $0x8] sm:$0xff] %vm28_vm0, %v295_v0  ;;  %v283_v2 = vld [vmem:[%s385_s1 + $0x30] sm:$0xff]  }
   0x2   :  { %261 = vmatpush3.bf16.msra.mxu0 %v282_v1  ;;  %v284_v3 = vld [vmem:[%s385_s1 + $0x28] sm:$0xff]   ;;  %v285_v4 = vld [vmem:[%s385_s1 + $0x20] sm:$0xff]   ;;  %v286_v5 = vld [vmem:[%s385_s1 + $0x18] sm:$0xff]  }
   0x3   :  { %262 = vmatprep.subr.bf16.mxu0 %v295_v0  ;;  %v287_v6 = vld [vmem:[%s385_s1 + $0x10] sm:$0xff]   ;;  %v288_v7 = vld [vmem:[%s385_s1 + $0x8] sm:$0xff]   ;;  %v289_v8 = vld [vmem:[%s385_s1] sm:$0xff]  }
   0x4   :  { %v290_v9 = vld [vmem:[%s386_s0] sm:$0xff]  }
   0x5   :  { %v248_v18 = vld [vmem:[%s387_s3] sm:$0xff]  }
   0x6   :  { %263 = vmatpush3.bf16.msra.mxu0 %v283_v2  ;;  %v240_v19 = vld [vmem:[%s388_s2] ss:$0 sm:$0xff]  ;;  %v249_v20 = vunpack.c.l.bf16 %v248_v18  ;;  %v250_v24 = vunpack.c.h.bf16 %v248_v18 }
   0x7   :  { %264 = vmatprep.subr.bf16.mxu0 %v295_v0  ;;  %v241_v47 = vld [vmem:[%s389_s4] ss:$0 sm:$0xff] }
   0x8   :  { %v31_v10 = vld [vmem:[#allocation2] sm:$0xff]  ;;  %v32_v14 = vld [vmem:[#allocation2 + $0x8] sm:$0xff] }
   0x9   :  { %v242_v49 = vld [vmem:[%s390_s5] ss:$0 sm:$0xff] }
   0xa   :  { %265 = vmatpush3.bf16.msra.mxu0 %v284_v3 }
   0xb   :  { %266 = vmatprep.subr.bf16.mxu0 %v295_v0 }
   0xe   :  { %267 = vmatpush3.bf16.msra.mxu0 %v285_v4 }
   0xf   :  { %268 = vmatprep.subr.bf16.mxu0 %v295_v0 }
  0x12   :  { %269 = vmatpush3.bf16.msra.mxu0 %v286_v5 }
  0x13   :  { %270 = vmatprep.subr.bf16.mxu0 %v295_v0 }
  0x16   :  { %271 = vmatpush3.bf16.msra.mxu0 %v287_v6 }
  0x17   :  { %272 = vmatprep.subr.bf16.mxu0 %v295_v0 }
  0x1a   :  { %273 = vmatpush3.bf16.msra.mxu0 %v288_v7 }
  0x1b   :  { %274 = vmatprep.subr.bf16.mxu0 %v295_v0 }
  0x1e   :  { %275 = vmatpush3.bf16.msra.mxu0 %v289_v8 }
  0x21   :  { %277 = vmatmul.mubr.bf16.vlgmr.msra.gmra.mxu0 %v290_v9 }
  0xe1   :  { %v139_v11 = vpop.f32.mrf.mxu0 }
  0xe2   :  { %v146_v12 = vadd.f32 %v139_v11, %v31_v10 }
  0xe3   :  { %v278_v13 = vpop.f32.mrf.mxu0 }
  0xe4   :  { %149 = vst.msk [vmem:[#allocation2] sm:$0xff] %vm28_vm0, %v146_v12 }
  0xe5   :  { %v142_v15 = vpop.f32.mrf.mxu0 }
  0xe6   :  { %v147_v16 = vadd.f32 %v142_v15, %v32_v14 }
  0xe7   :  { %v279_v17 = vpop.f32.mrf.mxu0 }
  0xe8   :  { %150 = vst.msk [vmem:[#allocation2 + $0x8] sm:$0xff] %vm28_vm0, %v147_v16 }
  0xeb   :  { %v154_v21 = vld [vmem:[#allocation2] sm:$0xff] }
  0xec   :  { %v163_v22 = vadd.f32 %v240_v19, %v154_v21 }
  0xee   :  { %v169_v23 = vadd.f32 %v249_v20, %v163_v22 }
  0xef   :  { %v155_v25 = vld [vmem:[#allocation2 + $0x8] sm:$0xff] }
  0xf0   :  { %v171_v26 = vsel %vm28_vm0, %v169_v23, 0.0  ;;  %v164_v27 = vadd.f32 %v240_v19, %v155_v25 }
  0xf1   :  { %172 = vadd.xlane.f32.xlu0 %v171_v26 }
  0xf2   :  { %v170_v28 = vadd.f32 %v250_v24, %v164_v27 }
  0xf4   :  { %v174_v29 = vsel %vm28_vm0, %v170_v28, 0.0 }
  0xf5   :  { %175 = vadd.xlane.f32.xlu0 %v174_v29 }
 0x17a   :  { %v173_v30 = vpop.xlane.xlu0 %172 }
 0x17b   :  { %v178_v31 = vmul.f32 0.015625, %v173_v30 }
 0x17d   :  { %v180_v32 = vsub.f32 %v169_v23, %v178_v31 }
 0x17e   :  { %v176_v33 = vpop.xlane.xlu0 %175 }
 0x17f   :  { %v179_v34 = vmul.f32 0.015625, %v176_v33  ;;  %v182_v35 = vmul.f32 %v180_v32, %v180_v32 }
 0x181   :  { %v181_v36 = vsub.f32 %v170_v28, %v179_v34  ;;  %v184_v37 = vsel %vm28_vm0, %v182_v35, 0.0 }
 0x182   :  { %185 = vadd.xlane.f32.xlu1 %v184_v37 }
 0x183   :  { %v183_v38 = vmul.f32 %v181_v36, %v181_v36 }
 0x185   :  { %v187_v39 = vsel %vm28_vm0, %v183_v38, 0.0 }
 0x186   :  { %188 = vadd.xlane.f32.xlu1 %v187_v39 }
 0x20b   :  { %v186_v40 = vpop.xlane.xlu1 %185 }
 0x20c   :  { %v190_v41 = vmul.f32 0.015625, %v186_v40 }
 0x20e   :  { %v192_v42 = vadd.f32 1e-12, %v190_v41 }
 0x20f   :  { %v189_v43 = vpop.xlane.xlu1 %188 }
 0x210   :  { %291 = vrsqrt.f32 %v192_v42  ;;  %v191_v44 = vmul.f32 0.015625, %v189_v43 }
 0x212   :  { %v193_v45 = vadd.f32 1e-12, %v191_v44 }
 0x214   :  { %293 = vrsqrt.f32 %v193_v45 }
 0x21d   :  { %v292_v46 = vpop.eup %291 }
 0x21e   :  { %v196_v48 = vmul.f32 %v292_v46, %v180_v32 }
 0x220   :  { %v205_v50 = vmul.f32 %v241_v47, %v196_v48 }
 0x221   :  { %v294_v51 = vpop.eup %293 }
 0x222   :  { %v214_v52 = vadd.f32 %v242_v49, %v205_v50  ;;  %v197_v53 = vmul.f32 %v294_v51, %v181_v36 }
 0x224   :  { %v245_v54 = vpack.c.bf16 %v214_v52, %v214_v52  ;;  %v206_v55 = vmul.f32 %v241_v47, %v197_v53 }
 0x226   :  { %225 = vst.msk [vmem:[%s391_s6] sm:$0xf] %vm224_vm2, %v245_v54  ;;  %v215_v56 = vadd.f32 %v242_v49, %v206_v55 }
 0x228   :  { %v246_v57 = vpack.c.bf16 %v215_v56, %v215_v56 }
 0x22a   :  { %226 = vst.msk [vmem:[%s391_s6 + $0x4] sm:$0xf] %vm224_vm2, %v246_v57 }

// kernel: bert_class_forward.16
= control target key start
LH: loop header
LB: loop body
LE: loop exit
PB: predicated region body
PF: predicated region fallthrough
CT: control target
= control target key end

     0   :  { %v249_v0 = vmov 0.0   ;;  %vm250_vm0 = vmmov 0   ;;  %s304_s1 = inlined_call_operand.vmem [shape: bf16[128,128], index: 1, kind: input, shape index: {}]   ;;  %s305_s0 = inlined_call_operand.vmem [shape: bf16[16,128], index: 0, kind: input, shape index: {}]   ;;  %s306_s2 = inlined_call_operand.vmem [shape: f32[1,128], index: 2, kind: input, shape index: {}]   ;;  %s307_s3 = inlined_call_operand.vmem [shape: bf16[16,128], index: 3, kind: output, shape index: {}]  }
   0x1   :  { %214 = vmatprep.subr.bf16.mxu0 %v249_v0  ;;  %v236_v1 = vld [vmem:[%s304_s1 + $0x38] sm:$0xff]   ;;  %230 = vmatprep.mubr.msk.bf16.mxu0 %vm250_vm0, %v249_v0  ;;  %v237_v2 = vld [vmem:[%s304_s1 + $0x30] sm:$0xff]   ;;  %v238_v3 = vld [vmem:[%s304_s1 + $0x28] sm:$0xff]  }
   0x2   :  { %215 = vmatpush3.bf16.msra.mxu0 %v236_v1  ;;  %v239_v4 = vld [vmem:[%s304_s1 + $0x20] sm:$0xff]   ;;  %v240_v5 = vld [vmem:[%s304_s1 + $0x18] sm:$0xff]   ;;  %v241_v6 = vld [vmem:[%s304_s1 + $0x10] sm:$0xff]  }
   0x3   :  { %216 = vmatprep.subr.bf16.mxu0 %v249_v0  ;;  %v242_v7 = vld [vmem:[%s304_s1 + $0x8] sm:$0xff]   ;;  %v243_v8 = vld [vmem:[%s304_s1] sm:$0xff]  }
   0x4   :  { %v244_v9 = vld [vmem:[%s305_s0] sm:$0xff]  }
   0x5   :  { %v195_v10 = vld [vmem:[%s306_s2] ss:$0 sm:$0xff] }
   0x6   :  { %217 = vmatpush3.bf16.msra.mxu0 %v237_v2 }
   0x7   :  { %218 = vmatprep.subr.bf16.mxu0 %v249_v0 }
   0xa   :  { %219 = vmatpush3.bf16.msra.mxu0 %v238_v3 }
   0xb   :  { %220 = vmatprep.subr.bf16.mxu0 %v249_v0 }
   0xe   :  { %221 = vmatpush3.bf16.msra.mxu0 %v239_v4 }
   0xf   :  { %222 = vmatprep.subr.bf16.mxu0 %v249_v0 }
  0x12   :  { %223 = vmatpush3.bf16.msra.mxu0 %v240_v5 }
  0x13   :  { %224 = vmatprep.subr.bf16.mxu0 %v249_v0 }
  0x16   :  { %225 = vmatpush3.bf16.msra.mxu0 %v241_v6 }
  0x17   :  { %226 = vmatprep.subr.bf16.mxu0 %v249_v0 }
  0x1a   :  { %227 = vmatpush3.bf16.msra.mxu0 %v242_v7 }
  0x1b   :  { %228 = vmatprep.subr.bf16.mxu0 %v249_v0 }
  0x1e   :  { %229 = vmatpush3.bf16.msra.mxu0 %v243_v8 }
  0x21   :  { %231 = vmatmul.mubr.bf16.vlgmr.msra.gmra.mxu0 %v244_v9 }
  0xe1   :  { %v129_v11 = vpop.f32.mrf.mxu0 }
  0xe2   :  { %v152_v12 = vadd.f32 %v195_v10, %v129_v11 }
  0xe3   :  { %v232_v13 = vpop.f32.mrf.mxu0 }
  0xe4   :  { %v156_v14 = vmul.f32 0.044715, %v152_v12  ;;  %v154_v30 = vmul.f32 0.5, %v152_v12 }
  0xe5   :  { %v132_v15 = vpop.f32.mrf.mxu0 }
  0xe6   :  { %v158_v16 = vmul.f32 %v156_v14, %v152_v12  ;;  %v153_v17 = vadd.f32 %v195_v10, %v132_v15 }
  0xe7   :  { %v233_v18 = vpop.f32.mrf.mxu0 }
  0xe8   :  { %v160_v19 = vmul.f32 %v158_v16, %v152_v12  ;;  %v157_v20 = vmul.f32 0.044715, %v153_v17  ;;  %v155_v31 = vmul.f32 0.5, %v153_v17 }
  0xea   :  { %v162_v21 = vadd.f32 %v160_v19, %v152_v12  ;;  %v159_v22 = vmul.f32 %v157_v20, %v153_v17 }
  0xec   :  { %v164_v23 = vmul.f32 0.7978846, %v162_v21  ;;  %v161_v24 = vmul.f32 %v159_v22, %v153_v17 }
  0xee   :  { %245 = vtanh.f32 %v164_v23  ;;  %v163_v25 = vadd.f32 %v161_v24, %v153_v17 }
  0xf0   :  { %v165_v26 = vmul.f32 0.7978846, %v163_v25 }
  0xf2   :  { %247 = vtanh.f32 %v165_v26 }
  0xfb   :  { %v246_v27 = vpop.eup %245 }
  0xfc   :  { %v168_v28 = vadd.f32 1.0, %v246_v27 }
  0xfe   :  { %v170_v33 = vmul.f32 %v168_v28, %v154_v30 }
  0xff   :  { %v248_v29 = vpop.eup %247 }
 0x100   :  { %v169_v32 = vadd.f32 1.0, %v248_v29 }
 0x102   :  { %v171_v34 = vmul.f32 %v169_v32, %v155_v31 }
 0x104   :  { %v203_v35 = vpack.c.bf16 %v171_v34, %v170_v33 }
 0x106   :  { %204 = vst [vmem:[%s307_s3] sm:$0xff] %v203_v35  }

// kernel: bert_class_forward.23
= control target key start
LH: loop header
LB: loop body
LE: loop exit
PB: predicated region body
PF: predicated region fallthrough
CT: control target
= control target key end

     0   :  { %v252_v0 = vmov 0.0   ;;  %vm253_vm0 = vmmov 0   ;;  %vm61_vm1 = vcmask 523264   ;;  %s322_s1 = inlined_call_operand.vmem [shape: bf16[64,64], index: 1, kind: input, shape index: {}]   ;;  %s323_s0 = inlined_call_operand.vmem [shape: bf16[8,64], index: 0, kind: input, shape index: {}]   ;;  %s324_s3 = inlined_call_operand.vmem [shape: bf16[64,128], index: 3, kind: input, shape index: {}]   ;;  %s325_s2 = inlined_call_operand.vmem [shape: f32[1,64], index: 2, kind: input, shape index: {}]   ;;  %s326_s4 = inlined_call_operand.vmem [shape: f32[1,128], index: 4, kind: input, shape index: {}]   ;;  %s327_s5 = inlined_call_operand.vmem [shape: f32[8,128], index: 5, kind: output, shape index: {}]  }
   0x1   :  { %216 = vmatprep.subr.bf16.mxu0 %v252_v0  ;;  %v242_v1 = vld [vmem:[%s322_s1 + $0x18] sm:$0xff]   ;;  %224 = vmatprep.mubr.msk.bf16.mxu0 %vm253_vm0, %v252_v0  ;;  %v243_v2 = vld [vmem:[%s322_s1 + $0x10] sm:$0xff]   ;;  %v244_v3 = vld [vmem:[%s322_s1 + $0x8] sm:$0xff]  }
   0x2   :  { %228 = vmatprep.subr.bf16.mxu1 %v252_v0  ;;  %236 = vmatprep.mubr.msk.bf16.mxu1 %vm253_vm0, %v252_v0  ;;  %v245_v4 = vld [vmem:[%s322_s1] sm:$0xff]   ;;  %v246_v6 = vld [vmem:[%s324_s3 + $0x18] sm:$0xff]   ;;  %v247_v7 = vld [vmem:[%s324_s3 + $0x10] sm:$0xff]  }
   0x3   :  { %217 = vmatpush3.bf16.msra.mxu0 %v242_v1  ;;  %v21_v5 = vld [vmem:[%s323_s0] sm:$0xf]  ;;  %229 = vmatpush3.bf16.msra.mxu1 %v246_v6  ;;  %v248_v8 = vld [vmem:[%s324_s3 + $0x8] sm:$0xff]  }
   0x4   :  { %218 = vmatprep.subr.bf16.mxu0 %v252_v0  ;;  %230 = vmatprep.subr.bf16.mxu1 %v252_v0  ;;  %v249_v9 = vld [vmem:[%s324_s3] sm:$0xff]  }
   0x5   :  { %v194_v10 = vld [vmem:[%s325_s2] ss:$0 sm:$0xff] }
   0x6   :  { %v200_v18 = vld [vmem:[%s326_s4] ss:$0 sm:$0xff] }
   0x7   :  { %219 = vmatpush3.bf16.msra.mxu0 %v243_v2  ;;  %231 = vmatpush3.bf16.msra.mxu1 %v247_v7 }
   0x8   :  { %220 = vmatprep.subr.bf16.mxu0 %v252_v0  ;;  %232 = vmatprep.subr.bf16.mxu1 %v252_v0 }
   0xb   :  { %221 = vmatpush3.bf16.msra.mxu0 %v244_v3  ;;  %233 = vmatpush3.bf16.msra.mxu1 %v248_v8 }
   0xc   :  { %222 = vmatprep.subr.bf16.mxu0 %v252_v0  ;;  %234 = vmatprep.subr.bf16.mxu1 %v252_v0 }
   0xf   :  { %223 = vmatpush3.bf16.msra.mxu0 %v245_v4  ;;  %235 = vmatpush3.bf16.msra.mxu1 %v249_v9 }
  0x12   :  { %225 = vmatmul.mubr.msk.bf16.vlgmr.msra.gmra.mxu0 %vm61_vm1, %v21_v5 }
  0xd2   :  { %v99_v11 = vpop.f32.mrf.mxu0 }
  0xd3   :  { %v100_v12 = vadd.f32 %v194_v10, %v99_v11 }
  0xd4   :  { %v226_v13 = vpop.f32.mrf.mxu0 }
  0xd5   :  { %250 = vtanh.f32 %v100_v12 }
  0xd6   :  { %v102_v14 = vpop.f32.mrf.mxu0 }
  0xd8   :  { %v227_v15 = vpop.f32.mrf.mxu0 }
  0xe2   :  { %v251_v16 = vpop.eup %250 }
  0xe3   :  { %v106_v17 = vpack.c.bf16 %v251_v16, %v251_v16 }
  0xe5   :  { %237 = vmatmul.mubr.msk.bf16.vlgmr.msra.gmra.mxu1 %vm61_vm1, %v106_v17 }
 0x1a5   :  { %v183_v19 = vpop.f32.mrf.mxu1 }
 0x1a6   :  { %v184_v20 = vadd.f32 %v200_v18, %v183_v19 }
 0x1a7   :  { %v238_v21 = vpop.f32.mrf.mxu1 }
 0x1a8   :  { %189 = vst [vmem:[%s327_s5] sm:$0xff] %v184_v20 }
 0x1a9   :  { %v186_v22 = vpop.f32.mrf.mxu1 }
 0x1ab   :  { %v239_v23 = vpop.f32.mrf.mxu1 }

</bundles_post_ra>
